<compile_context>
chip_gen: v7x
topology: tpu7x:2x2x1
jax: 0.10.0
libtpu: 0.0.40
codegen_flags: <defaults>
</compile_context>

<pallas_src>
import numpy as np
import jax
import jax.numpy as jnp
from jax import lax
from jax.experimental import pallas as pl
from jax.experimental.pallas import tpu as pltpu


# -----------------------------------------------------------------------------
# Kernel factory (N, HW are static and baked in via closure)
# -----------------------------------------------------------------------------
def _make_kernel(N, HW):
    def seg_head_kernel(xcol_ref, w1_ref, bnb_ref, w2_ref, b2_ref, kron_ref,
                        out_ref, y_ref):
        # xcol_ref : (9*Cin, N*HW)       bf16 im2col patches, batch in lanes
        # w1_ref   : (Cmid, 9*Cin)       bf16 conv1 weights with BN scale folded
        # bnb_ref  : (Cmid, 1)           f32 folded BN bias (conv1 bias included)
        # w2_ref   : (Ccls_pad, Cmid)    bf16 1x1 conv weights (zero-padded rows)
        # b2_ref   : (Ccls_pad, 1)       f32 1x1 conv bias     (zero-padded rows)
        # kron_ref : (HW, tcols)         bf16 column tile of kron(wr, wc)^T
        # out_ref  : (N*Ccls_pad, tcols) f32 output tile (NCHW-flat rows)
        # y_ref    : (N*Ccls_pad, HW)    bf16 scratch, persists across grid steps

        # Conv stage only once (grid iterates column tiles of the upsample).
        @pl.when(pl.program_id(0) == 0)
        def _():
            # conv1 (im2col matmul, BN scale pre-folded) + folded bias + ReLU
            acc = jnp.dot(w1_ref[...], xcol_ref[...],
                          preferred_element_type=jnp.float32)     # (Cmid, N*HW)
            h = jnp.maximum(acc + bnb_ref[...], 0.0)
            # conv2 (1x1)
            y = jnp.dot(w2_ref[...], h.astype(jnp.bfloat16),
                        preferred_element_type=jnp.float32) + b2_ref[...]
            # (Ccls_pad, N*HW) -> (N*Ccls_pad, HW): batch-major rows so the
            # single upsample matmul below emits the NCHW-flat output directly.
            yb = jnp.concatenate(
                [y[:, b * HW:(b + 1) * HW] for b in range(N)], axis=0)
            y_ref[...] = yb.astype(jnp.bfloat16)

        # bilinear x8 upsample: one MXU matmul per output column tile,
        # batch stacked along M -> lane-dense f32 store.
        up = jnp.dot(y_ref[...], kron_ref[...],
                     preferred_element_type=jnp.float32)   # (N*Ccls_pad, tcols)
        out_ref[...] = up.astype(out_ref.dtype)

    return seg_head_kernel


# -----------------------------------------------------------------------------
# Helpers
# -----------------------------------------------------------------------------
def bilinear_matrix(out_size, in_size, scale):
    """PyTorch bilinear (align_corners=False) interpolation matrix (out, in)."""
    i = np.arange(out_size, dtype=np.float64)
    src = (i + 0.5) / scale - 0.5
    src = np.maximum(src, 0.0)             # PyTorch clamps negative source idx
    i0 = np.minimum(np.floor(src).astype(np.int64), in_size - 1)
    i1 = np.minimum(i0 + 1, in_size - 1)
    lam = src - i0
    M = np.zeros((out_size, in_size), dtype=np.float64)
    M[np.arange(out_size), i0] += (1.0 - lam)
    M[np.arange(out_size), i1] += lam
    return M


def _choose_col_tile(total_cols, HW, rows_out, budget_bytes):
    """Largest column tile whose double-buffered kron + output tiles fit budget."""
    def var_bytes(t):
        return 2 * HW * t * 2 + 2 * rows_out * t * 4   # bf16 kron + f32 out, x2 bufs
    tc = total_cols
    while tc % 2 == 0 and (tc // 2) % 128 == 0 and var_bytes(tc) > budget_bytes:
        tc //= 2
    return tc


def seg_head_forward(x_nchw, params, scale=8, eps=1e-5):
    """Forward pass matching SimpleSegmentationHead (BN in eval mode)."""
    w1, b1, gamma, beta, rmean, rvar, w2, b2 = params
    N, Cin, H, W = x_nchw.shape
    Cmid = w1.shape[0]
    Ccls = w2.shape[0]
    Hout, Wout = H * scale, W * scale
    HW = H * W
    K1 = 9 * Cin
    Ccls_pad = -(-Ccls // 8) * 8            # sublane-aligned class count
    rows_out = N * Ccls_pad

    # ---- im2col (input is tiny), channel-major, batch flattened into lanes
    xpad = jnp.pad(x_nchw, ((0, 0), (0, 0), (1, 1), (1, 1)))
    patches = jnp.stack(
        [xpad[:, :, dy:dy + H, dx:dx + W] for dy in range(3) for dx in range(3)],
        axis=1)                                         # (N, 9, Cin, H, W)
    xcol = (patches.reshape(N, K1, HW)
                   .transpose(1, 0, 2)
                   .reshape(K1, N * HW)
                   .astype(jnp.bfloat16))               # (9*Cin, N*HW)

    # ---- fold BN (eval) scale into conv1 weights; fold conv1 bias into BN bias
    bn_scale = (gamma / jnp.sqrt(rvar + eps)).astype(jnp.float32)
    w1_scaled = w1.astype(jnp.float32) * bn_scale[:, None, None, None]
    w1_mat = (jnp.transpose(w1_scaled, (0, 2, 3, 1))
              .reshape(Cmid, K1).astype(jnp.bfloat16))  # (Cmid, 9*Cin)
    bnb = (((b1 - rmean) * bn_scale + beta)
           .astype(jnp.float32)[:, None])               # (Cmid, 1)

    # ---- conv2 (1x1), padded to Ccls_pad rows (pad rows are zero)
    w2_mat = jnp.zeros((Ccls_pad, Cmid), jnp.float32).at[:Ccls].set(w2[:, :, 0, 0])
    w2_mat = w2_mat.astype(jnp.bfloat16)
    b2_col = jnp.zeros((Ccls_pad, 1), jnp.float32).at[:Ccls, 0].set(b2)

    # ---- bilinear x8 as kron(wr, wc)^T (entries k/256 -> exact in bf16 for scale=8)
    wr = bilinear_matrix(Hout, H, scale)                # (Hout, H)
    wc = bilinear_matrix(Wout, W, scale)                # (Wout, W)
    kron_t = jnp.asarray(np.kron(wr, wc).T.astype(np.float32)).astype(jnp.bfloat16)

    # ---- column tiling: budget ALL double-buffered tiles (kron + output),
    #      conservative for v7x's 64 MiB per-TC VMEM.
    total_cols = Hout * Wout
    tcols = _choose_col_tile(total_cols, HW, rows_out, budget_bytes=20 << 20)
    n_ct = total_cols // tcols

    fixed_bytes = (2 * K1 * (N * HW) * 2                 # xcol (bf16, 2 bufs)
                   + 2 * (Cmid * K1 + Ccls_pad * Cmid) * 2
                   + 2 * (Cmid + Ccls_pad) * 128 * 4     # lane-padded bias cols
                   + rows_out * HW * 2)                  # y scratch
    var_bytes = 2 * HW * tcols * 2 + 2 * rows_out * tcols * 4
    vmem_limit = int(min(max(2 * (fixed_bytes + var_bytes), 16 << 20), 48 << 20))

    out_flat = pl.pallas_call(
        _make_kernel(N, HW),
        out_shape=jax.ShapeDtypeStruct((rows_out, total_cols), jnp.float32),
        grid_spec=pltpu.PrefetchScalarGridSpec(
            num_scalar_prefetch=0,
            grid=(n_ct,),
            in_specs=[
                pl.BlockSpec((K1, N * HW), lambda j: (0, 0)),
                pl.BlockSpec((Cmid, K1), lambda j: (0, 0)),
                pl.BlockSpec((Cmid, 1), lambda j: (0, 0)),
                pl.BlockSpec((Ccls_pad, Cmid), lambda j: (0, 0)),
                pl.BlockSpec((Ccls_pad, 1), lambda j: (0, 0)),
                pl.BlockSpec((HW, tcols), lambda j: (0, j)),
            ],
            out_specs=pl.BlockSpec((rows_out, tcols), lambda j: (0, j)),
            scratch_shapes=[pltpu.VMEM((rows_out, HW), jnp.bfloat16)],
        ),
        compiler_params=pltpu.CompilerParams(
            dimension_semantics=("arbitrary",),   # scratch reused across tiles
            vmem_limit_bytes=vmem_limit),
    )(xcol, w1_mat, bnb, w2_mat, b2_col, kron_t)

    # Free reshape (row-major) + slice off the padded classes.
    return out_flat.reshape(N, Ccls_pad, Hout, Wout)[:, :Ccls]


def seg_head_reference(x_nchw, params, scale=8, eps=1e-5):
    """Pure-JAX f32 reference (mirrors the torch module, BN in eval mode)."""
    w1, b1, gamma, beta, rmean, rvar, w2, b2 = params
    N, Cin, H, W = x_nchw.shape
    y = lax.conv_general_dilated(
        x_nchw, w1, window_strides=(1, 1), padding=((1, 1), (1, 1)),
        dimension_numbers=('NCHW', 'OIHW', 'NCHW')) + b1[None, :, None, None]
    s = gamma / jnp.sqrt(rvar + eps)
    y = (y - rmean[None, :, None, None]) * s[None, :, None, None] + beta[None, :, None, None]
    y = jnp.maximum(y, 0.0)
    y = lax.conv_general_dilated(
        y, w2, window_strides=(1, 1), padding='VALID',
        dimension_numbers=('NCHW', 'OIHW', 'NCHW')) + b2[None, :, None, None]
    wr = jnp.asarray(bilinear_matrix(H * scale, H, scale), dtype=jnp.float32)
    wc = jnp.asarray(bilinear_matrix(W * scale, W, scale), dtype=jnp.float32)
    return jnp.einsum('Hh,nchw,Ww->ncHW', wr, y, wc)


# -----------------------------------------------------------------------------
if __name__ == "__main__":
    key = jax.random.PRNGKey(0)
    ks = jax.random.split(key, 10)

    N, Cin, H, W = 2, 64, 8, 8      # module default in_channels=64
    Cmid, Ccls = 32, 37

    x = jax.random.normal(ks[0], (N, Cin, H, W), dtype=jnp.float32)

    # Deterministic synthetic parameters (shapes from the module __init__).
    w1 = 0.05 * jax.random.normal(ks[1], (Cmid, Cin, 3, 3), dtype=jnp.float32)
    b1 = 0.05 * jax.random.normal(ks[2], (Cmid,), dtype=jnp.float32)
    gamma = 1.0 + 0.1 * jax.random.normal(ks[3], (Cmid,), dtype=jnp.float32)
    beta = 0.1 * jax.random.normal(ks[4], (Cmid,), dtype=jnp.float32)
    rmean = 0.1 * jax.random.normal(ks[5], (Cmid,), dtype=jnp.float32)
    rvar = 1.0 + 0.1 * jnp.abs(jax.random.normal(ks[6], (Cmid,), dtype=jnp.float32))
    w2 = 0.05 * jax.random.normal(ks[7], (Ccls, Cmid, 1, 1), dtype=jnp.float32)
    b2 = 0.05 * jax.random.normal(ks[8], (Ccls,), dtype=jnp.float32)
    params = (w1, b1, gamma, beta, rmean, rvar, w2, b2)

    out = jax.block_until_ready(seg_head_forward(x, params))
    assert out.shape == (N, Ccls, H * 8, W * 8), out.shape

    ref = jax.block_until_ready(seg_head_reference(x, params))
    # bf16 matmul operands (f32 accumulation) -> compare with bf16-level tolerance.
    assert np.allclose(np.asarray(out), np.asarray(ref), atol=2e-2, rtol=2e-2), \
        float(np.max(np.abs(np.asarray(out) - np.asarray(ref))))

    print("KERNEL_OK")
</pallas_src>

<mosaic_0001>
module attributes {stable_mosaic.version = 11 : i64} {
  func.func @seg_head_kernel(%arg0: i32, %arg1: memref<576x128xbf16, #tpu.memory_space<vmem>>, %arg2: memref<32x576xbf16, #tpu.memory_space<vmem>>, %arg3: memref<32x1xf32, #tpu.memory_space<vmem>>, %arg4: memref<40x32xbf16, #tpu.memory_space<vmem>>, %arg5: memref<40x1xf32, #tpu.memory_space<vmem>>, %arg6: memref<64x4096xbf16, #tpu.memory_space<vmem>>, %arg7: memref<80x4096xf32, #tpu.memory_space<vmem>>, %arg8: memref<80x64xbf16, #tpu.memory_space<vmem>>) attributes {dimension_semantics = [#tpu.dimension_semantics<arbitrary>], iteration_bounds = array<i64: 1>, scalar_prefetch = 0 : i64, scratch_operands = 1 : i64, tpu.core_type = #tpu.core_type<tc>, window_params = [{pipeline_mode = #tpu.pipeline_mode<synchronous>, transform_indices = @transform_0, window_bounds = array<i64: 576, 128>}, {pipeline_mode = #tpu.pipeline_mode<synchronous>, transform_indices = @transform_1, window_bounds = array<i64: 32, 576>}, {pipeline_mode = #tpu.pipeline_mode<synchronous>, transform_indices = @transform_2, window_bounds = array<i64: 32, 1>}, {pipeline_mode = #tpu.pipeline_mode<synchronous>, transform_indices = @transform_3, window_bounds = array<i64: 40, 32>}, {pipeline_mode = #tpu.pipeline_mode<synchronous>, transform_indices = @transform_4, window_bounds = array<i64: 40, 1>}, {transform_indices = @transform_5, window_bounds = array<i64: 64, 4096>}, {transform_indices = @transform_6, window_bounds = array<i64: 80, 4096>}]} {
    %c0_i32 = arith.constant 0 : i32
    %0 = arith.cmpi eq, %arg0, %c0_i32 : i32
    %1 = arith.extui %0 : i1 to i32
    %c0_i32_0 = arith.constant 0 : i32
    %2 = arith.cmpi ne, %1, %c0_i32_0 : i32
    scf.if %2 {
      %c0_6 = arith.constant 0 : index
      %c0_7 = arith.constant 0 : index
      %7 = vector.load %arg2[%c0_6, %c0_7] : memref<32x576xbf16, #tpu.memory_space<vmem>>, vector<32x576xbf16>
      %c0_8 = arith.constant 0 : index
      %c0_9 = arith.constant 0 : index
      %8 = vector.load %arg1[%c0_8, %c0_9] : memref<576x128xbf16, #tpu.memory_space<vmem>>, vector<576x128xbf16>
      %cst_10 = arith.constant dense<0.000000e+00> : vector<32x128xf32>
      %9 = tpu.matmul %7, %8, %cst_10 {dimension_numbers = #tpu.dot_dimension_numbers<[1], [0], [0], [1], [0, 0, 1, 1], [], []>} : vector<32x576xbf16>, vector<576x128xbf16>, vector<32x128xf32> -> vector<32x128xf32>
      %c0_11 = arith.constant 0 : index
      %c0_12 = arith.constant 0 : index
      %10 = vector.load %arg3[%c0_11, %c0_12] : memref<32x1xf32, #tpu.memory_space<vmem>>, vector<32x1xf32>
      %11 = vector.broadcast %10 : vector<32x1xf32> to vector<32x128xf32>
      %12 = arith.addf %9, %11 : vector<32x128xf32>
      %cst_13 = arith.constant 0.000000e+00 : f32
      %13 = vector.broadcast %cst_13 : f32 to vector<32x128xf32>
      %14 = arith.maximumf %12, %13 : vector<32x128xf32>
      %c0_14 = arith.constant 0 : index
      %c0_15 = arith.constant 0 : index
      %15 = vector.load %arg4[%c0_14, %c0_15] : memref<40x32xbf16, #tpu.memory_space<vmem>>, vector<40x32xbf16>
      %16 = arith.truncf %14 : vector<32x128xf32> to vector<32x128xbf16>
      %cst_16 = arith.constant dense<0.000000e+00> : vector<40x128xf32>
      %17 = tpu.matmul %15, %16, %cst_16 {dimension_numbers = #tpu.dot_dimension_numbers<[1], [0], [0], [1], [0, 0, 1, 1], [], []>} : vector<40x32xbf16>, vector<32x128xbf16>, vector<40x128xf32> -> vector<40x128xf32>
      %c0_17 = arith.constant 0 : index
      %c0_18 = arith.constant 0 : index
      %18 = vector.load %arg5[%c0_17, %c0_18] : memref<40x1xf32, #tpu.memory_space<vmem>>, vector<40x1xf32>
      %19 = vector.broadcast %18 : vector<40x1xf32> to vector<40x128xf32>
      %20 = arith.addf %17, %19 : vector<40x128xf32>
      %21 = vector.extract_strided_slice %20 {offsets = [0, 0], sizes = [40, 64], strides = [1, 1]} : vector<40x128xf32> to vector<40x64xf32>
      %22 = vector.extract_strided_slice %20 {offsets = [0, 64], sizes = [40, 64], strides = [1, 1]} : vector<40x128xf32> to vector<40x64xf32>
      %23 = tpu.concatenate %21, %22 in 0 : vector<40x64xf32>, vector<40x64xf32> -> vector<80x64xf32>
      %24 = arith.truncf %23 : vector<80x64xf32> to vector<80x64xbf16>
      %c0_19 = arith.constant 0 : index
      %c0_20 = arith.constant 0 : index
      %25 = vector.load %arg8[%c0_19, %c0_20] : memref<80x64xbf16, #tpu.memory_space<vmem>>, vector<80x64xbf16>
      tpu.vector_store %arg8[%c0_19, %c0_20], %24 {strides = array<i32>} : memref<80x64xbf16, #tpu.memory_space<vmem>>, vector<80x64xbf16>,
    } else {
    }
    %c0 = arith.constant 0 : index
    %c0_1 = arith.constant 0 : index
    %3 = vector.load %arg8[%c0, %c0_1] : memref<80x64xbf16, #tpu.memory_space<vmem>>, vector<80x64xbf16>
    %c0_2 = arith.constant 0 : index
    %c0_3 = arith.constant 0 : index
    %4 = vector.load %arg6[%c0_2, %c0_3] : memref<64x4096xbf16, #tpu.memory_space<vmem>>, vector<64x4096xbf16>
    %cst = arith.constant dense<0.000000e+00> : vector<80x4096xf32>
    %5 = tpu.matmul %3, %4, %cst {dimension_numbers = #tpu.dot_dimension_numbers<[1], [0], [0], [1], [0, 0, 1, 1], [], []>} : vector<80x64xbf16>, vector<64x4096xbf16>, vector<80x4096xf32> -> vector<80x4096xf32>
    %c0_4 = arith.constant 0 : index
    %c0_5 = arith.constant 0 : index
    %6 = vector.load %arg7[%c0_4, %c0_5] : memref<80x4096xf32, #tpu.memory_space<vmem>>, vector<80x4096xf32>
    tpu.vector_store %arg7[%c0_4, %c0_5], %5 {strides = array<i32>} : memref<80x4096xf32, #tpu.memory_space<vmem>>, vector<80x4096xf32>,
    return
  }
  func.func @transform_0(%arg0: i32) -> (i32, i32) {
    %c0_i32 = arith.constant 0 : i32
    %c0_i32_0 = arith.constant 0 : i32
    %c0_i32_1 = arith.constant 0 : i32
    return %c0_i32, %c0_i32_0 : i32, i32
  }
  func.func @transform_1(%arg0: i32) -> (i32, i32) {
    %c0_i32 = arith.constant 0 : i32
    %c0_i32_0 = arith.constant 0 : i32
    %c0_i32_1 = arith.constant 0 : i32
    return %c0_i32, %c0_i32_0 : i32, i32
  }
  func.func @transform_2(%arg0: i32) -> (i32, i32) {
    %c0_i32 = arith.constant 0 : i32
    %c0_i32_0 = arith.constant 0 : i32
    %c0_i32_1 = arith.constant 0 : i32
    return %c0_i32, %c0_i32_0 : i32, i32
  }
  func.func @transform_3(%arg0: i32) -> (i32, i32) {
    %c0_i32 = arith.constant 0 : i32
    %c0_i32_0 = arith.constant 0 : i32
    %c0_i32_1 = arith.constant 0 : i32
    return %c0_i32, %c0_i32_0 : i32, i32
  }
  func.func @transform_4(%arg0: i32) -> (i32, i32) {
    %c0_i32 = arith.constant 0 : i32
    %c0_i32_0 = arith.constant 0 : i32
    %c0_i32_1 = arith.constant 0 : i32
    return %c0_i32, %c0_i32_0 : i32, i32
  }
  func.func @transform_5(%arg0: i32) -> (i32, i32) {
    %c0_i32 = arith.constant 0 : i32
    %c0_i32_0 = arith.constant 0 : i32
    return %c0_i32, %arg0 : i32, i32
  }
  func.func @transform_6(%arg0: i32) -> (i32, i32) {
    %c0_i32 = arith.constant 0 : i32
    %c0_i32_0 = arith.constant 0 : i32
    return %c0_i32, %arg0 : i32, i32
  }
}

</mosaic_0001>

<bundles_post_ra>
// kernel: tpu_custom_call.1
= control target key start
LH: loop header
LB: loop body
LE: loop exit
PB: predicated region body
PF: predicated region fallthrough
CT: control target
= control target key end

     0   :  { %11 = vsyncpa [#allocation4], 0  ;;  %s4179_s0 = inlined_call_operand.hbm [shape: bf16[576,128], index: 0, kind: input, shape index: {}]   ;;  %s4180_s1 = inlined_call_operand.hbm [shape: bf16[32,576], index: 1, kind: input, shape index: {}]   ;;  %s4181_s2 = inlined_call_operand.vmem [shape: f32[32,1], index: 2, kind: input, shape index: {}]   ;;  %s4182_s3 = inlined_call_operand.vmem [shape: bf16[40,32], index: 3, kind: input, shape index: {}]   ;;  %s4183_s4 = inlined_call_operand.vmem [shape: f32[40,1], index: 4, kind: input, shape index: {}]   ;;  %s4184_s5 = inlined_call_operand.hbm [shape: bf16[64,4096], index: 5, kind: input, shape index: {}]   ;;  %s4185_s6 = inlined_call_operand.hbm [shape: f32[80,4096], index: 6, kind: output, shape index: {}]  }
   0x1   :  { %12 = vsyncpa [#allocation7], 0 }
   0x2   :  { %13 = vsyncpa [#allocation5], 0  ;;  %s3739_s21 = smov [#allocation6]   ;;  %s3645_s25 = scalar_lea.hbm %s4180_s1, 1280 }
   0x3   :  { %s31_s22 = sshll.u32 %s3739_s21, 4  ;;  %p3646_p0 = scmp.ne.s32.totalorder %s4180_s1, %s3645_s25  ;;  %s32_s22 = int_to_ptr.vmem [resolvable:$true] %s31_s22 }
   0x4   :  { %p3649_p1 = scmp.lt.u32.totalorder %s3645_s25, %s4180_s1 }
   0x6   :  { %p3651_p2 = pnand %p3649_p1, %p3646_p0 }
   0x8   :  { %3654 = shalt.err (!%p3651_p2)
}
   0x9   :  { %s3655_s30 = scalar_lea.vmem %s32_s22, 1280  ;;  %p3660_p4 = scmp.lt.s32.totalorder %s32_s22, %s32_s22 }
   0xa   :  { %p3656_p3 = scmp.ne.s32.totalorder %s32_s22, %s3655_s30  ;;  %p3661_p5 = scmp.lt.s32.totalorder %s3655_s30, %s3655_s30 }
   0xc   :  { %p3662_p6 = por %p3661_p5, %p3660_p4 }
   0xe   :  { %p3663_p7 = pnand %p3662_p6, %p3656_p3 }
  0x10   :  { %3666 = shalt.err (!%p3663_p7)
}
  0x11   :  { %s3740_s7 = smov 320   ;;  %s3741_s8 = smov 20  }
  0x12   :  { %37 = dma.hbm_to_vmem [thread:$0]  %s4180_s1, 1280, %s32_s22, [#allocation7], %s3740_s7, %s3740_s7, %s3741_s8  }
  0x13   :  { %s3742_s11 = smov [#allocation3]   ;;  %s3667_s15 = scalar_lea.hbm %s4179_s0, 4608 }
  0x14   :  { %s19_s12 = sshll.u32 %s3742_s11, 4  ;;  %p3668_p8 = scmp.ne.s32.totalorder %s4179_s0, %s3667_s15  ;;  %s20_s12 = int_to_ptr.vmem [resolvable:$true] %s19_s12 }
  0x15   :  { %p3671_p9 = scmp.lt.u32.totalorder %s3667_s15, %s4179_s0 }
  0x17   :  { %p3673_p10 = pnand %p3671_p9, %p3668_p8 }
  0x19   :  { %3676 = shalt.err (!%p3673_p10)
}
  0x1a   :  { %s3677_s20 = scalar_lea.vmem %s20_s12, 4608  ;;  %p3682_p12 = scmp.lt.s32.totalorder %s20_s12, %s20_s12 }
  0x1b   :  { %p3678_p11 = scmp.ne.s32.totalorder %s20_s12, %s3677_s20  ;;  %p3683_p13 = scmp.lt.s32.totalorder %s3677_s20, %s3677_s20 }
  0x1d   :  { %p3684_p0 = por %p3683_p13, %p3682_p12 }
  0x1f   :  { %p3685_p1 = pnand %p3684_p0, %p3678_p11 }
  0x21   :  { %3688 = shalt.err (!%p3685_p1)
}
  0x22   :  { %s3743_s1 = smov 64   ;;  %s3744_s21 = smov 4  }
  0x23   :  { %25 = dma.hbm_to_vmem [thread:$0]  %s4179_s0, 4608, %s20_s12, [#allocation4], %s3743_s1, %s3743_s1, %s3744_s21  }
  0x24   :  { %s3745_s24 = smov [#allocation8]   ;;  %s3689_s28 = scalar_lea.hbm %s4184_s5, 16384 }
  0x25   :  { %s49_s25 = sshll.u32 %s3745_s24, 4  ;;  %p3690_p2 = scmp.ne.s32.totalorder %s4184_s5, %s3689_s28  ;;  %s50_s25 = int_to_ptr.vmem [resolvable:$true] %s49_s25 }
  0x26   :  { %p3693_p3 = scmp.lt.u32.totalorder %s3689_s28, %s4184_s5 }
  0x28   :  { %p3695_p4 = pnand %p3693_p3, %p3690_p2 }
  0x2a   :  { %3698 = shalt.err (!%p3695_p4)
}
  0x2b   :  { %s3699_s9 = scalar_lea.vmem %s50_s25, 16384  ;;  %p3704_p6 = scmp.lt.s32.totalorder %s50_s25, %s50_s25 }
  0x2c   :  { %p3700_p5 = scmp.ne.s32.totalorder %s50_s25, %s3699_s9  ;;  %p3705_p7 = scmp.lt.s32.totalorder %s3699_s9, %s3699_s9 }
  0x2e   :  { %p3706_p8 = por %p3705_p7, %p3704_p6 }
  0x30   :  { %p3707_p9 = pnand %p3706_p8, %p3700_p5 }
  0x32   :  { %3710 = shalt.err (!%p3707_p9)
}
  0x33   :  { %s3746_s0 = smov 2048   ;;  %s3747_s10 = smov 128  }
  0x34   :  { %55 = dma.hbm_to_vmem [thread:$0]  %s4184_s5, 16384, %s50_s25, [#allocation7], %s3746_s0, %s3746_s0, %s3747_s10  }
  0x35   :  { %3733 = dma.done.wait [#allocation4], 4608  }
  0x36   :  { %3734 = vsyncadd [#allocation4], 4294962688 }
  0x37   :  { %3735 = dma.done.wait [#allocation7], 17664  }
  0x38   :  { %3736 = vsyncadd [#allocation7], 4294949632  ;;  %v3748_v0 = vmov 0   ;;  %v3587_v1 = vld [vmem:[#allocation3 + $0x40] sm:$0xff]   ;;  %v3591_v5 = vld [vmem:[#allocation3 + $0x48] sm:$0xff]   ;;  %vm444_vm0 = vcmask 523264  }
  0x39   :  { %3575 = vset.pattern.permute.xlu0 %v3748_v0  ;;  %3576 = vset.pattern.permute.xlu1 %v3748_v0  ;;  %v3588_v2 = vld [vmem:[#allocation3] sm:$0xff]   ;;  %v3592_v6 = vld [vmem:[#allocation3 + $0x8] sm:$0xff]   ;;  %v3595_v9 = vld [vmem:[#allocation3 + $0x50] sm:$0xff]   ;;  %v3749_v56 = vmov 0.0   ;;  %vm3750_vm1 = vmmov 0   ;;  %vm652_vm2 = vcmask 261120  }
  0x3a   :  { %3465 = vmatprep.subr.bf16.mxu0 %v3587_v1  ;;  %v3589_v3 = vld [vmem:[#allocation3 + $0xc0] sm:$0xff]   ;;  %v3593_v7 = vld [vmem:[#allocation3 + $0xc8] sm:$0xff]   ;;  %v3596_v10 = vld [vmem:[#allocation3 + $0x10] sm:$0xff]  }
  0x3b   :  { %3466 = vmatpush3.bf16.msra.mxu0 %v3588_v2  ;;  %v3590_v4 = vld [vmem:[#allocation3 + $0x80] sm:$0xff]   ;;  %3493 = vmatprep.subr.bf16.mxu1 %v3589_v3  ;;  %v3594_v8 = vld [vmem:[#allocation3 + $0x88] sm:$0xff]   ;;  %v3597_v11 = vld [vmem:[#allocation3 + $0xd0] sm:$0xff]  }
  0x3c   :  { %3494 = vmatpush3.bf16.msra.mxu1 %v3590_v4  ;;  %3467 = vmatprep.subr.bf16.mxu0 %v3591_v5  ;;  %v3598_v12 = vld [vmem:[#allocation3 + $0x90] sm:$0xff]   ;;  %v3599_v13 = vld [vmem:[#allocation3 + $0x58] sm:$0xff]   ;;  %v3603_v17 = vld [vmem:[#allocation3 + $0x60] sm:$0xff]  }
  0x3d   :  { %3495 = vmatprep.subr.bf16.mxu1 %v3593_v7  ;;  %v3600_v14 = vld [vmem:[#allocation3 + $0x18] sm:$0xff]   ;;  %v3604_v18 = vld [vmem:[#allocation3 + $0x20] sm:$0xff]   ;;  %v3607_v21 = vld [vmem:[#allocation3 + $0x68] sm:$0xff]  }
  0x3e   :  { %v3601_v15 = vld [vmem:[#allocation3 + $0xd8] sm:$0xff]   ;;  %v3605_v19 = vld [vmem:[#allocation3 + $0xe0] sm:$0xff]   ;;  %v3608_v22 = vld [vmem:[#allocation3 + $0x28] sm:$0xff]  }
  0x3f   :  { %3468 = vmatpush3.bf16.msra.mxu0 %v3592_v6  ;;  %v3602_v16 = vld [vmem:[#allocation3 + $0x98] sm:$0xff]   ;;  %v3606_v20 = vld [vmem:[#allocation3 + $0xa0] sm:$0xff]   ;;  %v3609_v23 = vld [vmem:[#allocation3 + $0xe8] sm:$0xff]  }
  0x40   :  { %3496 = vmatpush3.bf16.msra.mxu1 %v3594_v8  ;;  %3469 = vmatprep.subr.bf16.mxu0 %v3595_v9  ;;  %v3610_v24 = vld [vmem:[#allocation3 + $0xa8] sm:$0xff]   ;;  %v3611_v25 = vld [vmem:[#allocation3 + $0x70] sm:$0xff]   ;;  %v3615_v29 = vld [vmem:[#allocation3 + $0x78] sm:$0xff]  }
  0x41   :  { %3497 = vmatprep.subr.bf16.mxu1 %v3597_v11  ;;  %v3612_v26 = vld [vmem:[#allocation3 + $0x30] sm:$0xff]   ;;  %v3616_v30 = vld [vmem:[#allocation3 + $0x38] sm:$0xff]   ;;  %v3622_v35 = vld [vmem:[#allocation3 + $0x100] sm:$0xff]  }
  0x42   :  { %v3613_v27 = vld [vmem:[#allocation3 + $0xf0] sm:$0xff]   ;;  %v3617_v31 = vld [vmem:[#allocation3 + $0xf8] sm:$0xff]   ;;  %v3625_v37 = vld [vmem:[#allocation6 + $0xc] ss:$20 sps:$4 sm:$0xff]  }
  0x43   :  { %3470 = vmatpush3.bf16.msra.mxu0 %v3596_v10  ;;  %v3614_v28 = vld [vmem:[#allocation3 + $0xb0] sm:$0xff]   ;;  %v3620_v33 = vld [vmem:[#allocation6 + $0x4] ss:$20 sps:$4 sm:$0xff]   ;;  %v3623_v36 = vld [vmem:[#allocation6 + $0x8] ss:$20 sps:$4 sm:$0xff]   ;;  %532 = vmatprep.mubr.bf16.mxu1 %v3625_v37 }
  0x44   :  { %3498 = vmatpush3.bf16.msra.mxu1 %v3598_v12  ;;  %3471 = vmatprep.subr.bf16.mxu0 %v3599_v13  ;;  %v3618_v32 = vld [vmem:[#allocation6] ss:$20 sps:$4 sm:$0xff]   ;;  %v3621_v34 = vld [vmem:[#allocation3 + $0xb8] sm:$0xff]   ;;  %v3626_v38 = vld [vmem:[#allocation3 + $0x108] sm:$0xff]  }
  0x45   :  { %3499 = vmatprep.subr.bf16.mxu1 %v3601_v15  ;;  %483 = vmatprep.mubr.bf16.mxu0 %v3620_v33  ;;  %v3627_v39 = vld [vmem:[#allocation6 + $0x2c] ss:$20 sps:$4 sm:$0xff]   ;;  %v3629_v40 = vld [vmem:[#allocation6 + $0x28] ss:$20 sps:$4 sm:$0xff]   ;;  %v3630_v41 = vld [vmem:[#allocation3 + $0x110] sm:$0xff]  }
  0x46   :  { %v3631_v42 = vld [vmem:[#allocation6 + $0x34] ss:$20 sps:$4 sm:$0xff]   ;;  %v3633_v43 = vld [vmem:[#allocation6 + $0x30] ss:$20 sps:$4 sm:$0xff]   ;;  %v3634_v44 = vld [vmem:[#allocation3 + $0x118] sm:$0xff]  }
  0x47   :  { %3472 = vmatpush3.bf16.msra.mxu0 %v3600_v14  ;;  %v3635_v45 = vld [vmem:[#allocation6 + $0x10] ss:$20 sps:$4 sm:$0xff]   ;;  %v154_v46 = vld [vmem:[%s4181_s2] sm:$0xff]  ;;  %v156_v47 = vld [vmem:[%s4181_s2 + $0x10] sm:$0xff] }
  0x48   :  { %3500 = vmatpush3.bf16.msra.mxu1 %v3602_v16  ;;  %3473 = vmatprep.subr.bf16.mxu0 %v3603_v17  ;;  %v155_v48 = vld [vmem:[%s4181_s2 + $0x8] sm:$0xff]  ;;  %v157_v49 = vld [vmem:[%s4181_s2 + $0x18] sm:$0xff]  ;;  %v3636_v50 = vld [vmem:[#allocation6 + $0x38] ss:$20 sps:$4 sm:$0xff]  }
  0x49   :  { %3501 = vmatprep.subr.bf16.mxu1 %v3605_v19  ;;  %160 = vperm.xlu0 %3575, %v154_v46   ;;  %v609_v51 = vld [vmem:[%s4183_s4] sm:$0xff]  ;;  %v610_v52 = vld [vmem:[%s4183_s4 + $0x8] sm:$0xff]  ;;  %v611_v53 = vld [vmem:[%s4183_s4 + $0x10] sm:$0xff] }
  0x4a   :  { %170 = vperm.xlu1 %3576, %v156_v47   ;;  %v612_v54 = vld [vmem:[%s4183_s4 + $0x18] sm:$0xff]  ;;  %v613_v55 = vld [vmem:[%s4183_s4 + $0x20] sm:$0xff] }
  0x4b   :  { %3474 = vmatpush3.bf16.msra.mxu0 %v3604_v18  ;;  %v753_v57 = vld [vmem:[#allocation8] sm:$0xff] }
  0x4c   :  { %3502 = vmatpush3.bf16.msra.mxu1 %v3606_v20  ;;  %3475 = vmatprep.subr.bf16.mxu0 %v3607_v21  ;;  %v769_v58 = vld [vmem:[#allocation8 + $0x80] sm:$0xff] }
  0x4d   :  { %3503 = vmatprep.subr.bf16.mxu1 %v3609_v23  ;;  %165 = vperm.xlu0 %3575, %v155_v48   ;;  %v3257_v59 = vcombine.low %v753_v57, %v769_v58  ;;  %v3258_v60 = vcombine.high %v753_v57, %v769_v58  ;;  %v754_v48 = vld [vmem:[#allocation8 + $0x8] sm:$0xff]  ;;  %v801_v57 = vld [vmem:[#allocation8 + $0x180] sm:$0xff] }
  0x4e   :  { %175 = vperm.xlu1 %3576, %v157_v49   ;;  %v770_v49 = vld [vmem:[#allocation8 + $0x88] sm:$0xff] }
  0x4f   :  { %3476 = vmatpush3.bf16.msra.mxu0 %v3608_v22  ;;  %v786_v58 = vld [vmem:[#allocation8 + $0x108] sm:$0xff] }
  0x50   :  { %3504 = vmatpush3.bf16.msra.mxu1 %v3610_v24  ;;  %3477 = vmatprep.subr.bf16.mxu0 %v3611_v25 }
  0x51   :  { %3505 = vmatprep.subr.bf16.mxu1 %v3613_v27  ;;  %616 = vperm.xlu0 %3575, %v609_v51   ;;  %v3637_v51 = vld [vmem:[%s4182_s3] sm:$0xff]  }
  0x52   :  { %621 = vperm.xlu1 %3576, %v610_v52   ;;  %v3259_v52 = vcombine.low %v754_v48, %v770_v49 }
  0x53   :  { %3478 = vmatpush3.bf16.msra.mxu0 %v3612_v26 }
  0x54   :  { %3506 = vmatpush3.bf16.msra.mxu1 %v3614_v28  ;;  %3479 = vmatprep.subr.bf16.mxu0 %v3615_v29 }
  0x55   :  { %3507 = vmatprep.subr.bf16.mxu1 %v3617_v31  ;;  %626 = vperm.xlu0 %3575, %v611_v53   ;;  %v3638_v53 = vld [vmem:[%s4182_s3 + $0x8] sm:$0xff]  }
  0x56   :  { %631 = vperm.xlu1 %3576, %v612_v54   ;;  %v3639_v54 = vld [vmem:[%s4182_s3 + $0x10] ss:$0 sps:$4 sm:$0xff]   ;;  %s3751_s3 = smov [#allocation9]  }
  0x57   :  { %3480 = vmatpush3.bf16.msra.mxu0 %v3616_v30 }
  0x58   :  { %3508 = vmatpush3.bf16.msra.mxu1 %v3621_v34  ;;  %3532 = vmatprep.subr.bf16.mxu0 %v3622_v35 }
  0x59   :  { %636 = vperm.xlu0 %3575, %v613_v55   ;;  %3544 = vmatprep.subr.bf16.mxu1 %v3749_v56  ;;  %v785_v55 = vld [vmem:[#allocation8 + $0x100] sm:$0xff] }
  0x5a   :  { %484 = vmatmul.mubr.bf16.vlgmr.msra.gmra.mrb[0].mxu0 %v3618_v32 }
  0x5b   :  { %3533 = vmatpush3.bf16.msra.mxu0 %v3622_v35  ;;  %533 = vmatmul.mubr.bf16.vlgmr.msra.gmra.mrb[0].mxu1 %v3623_v36 }
  0x5c   :  { %3534 = vmatprep.subr.bf16.mxu0 %v3626_v38  ;;  %491 = vmatprep.mubr.bf16.mxu0 %v3627_v39 }
  0x5d   :  { %540 = vmatprep.mubr.bf16.mxu1 %v3631_v42 }
  0x5f   :  { %3535 = vmatpush3.bf16.msra.mxu0 %v3626_v38 }
  0x60   :  { %3536 = vmatprep.subr.bf16.mxu0 %v3630_v41 }
  0x62   :  { %492 = vmatmul.mubr.bf16.gmra.mrb[4].mxu0 %v3629_v40 }
  0x63   :  { %3540 = vmatprep.mubr.msk.bf16.mxu0 %vm444_vm0, %v3635_v45  ;;  %3537 = vmatpush3.bf16.msra.mxu0 %v3630_v41 }
  0x64   :  { %541 = vmatmul.mubr.bf16.gmra.mrb[4].mxu1 %v3633_v43  ;;  %3538 = vmatprep.subr.bf16.mxu0 %v3634_v44 }
  0x65   :  { %3548 = vmatprep.mubr.msk.bf16.mxu1 %vm3750_vm1, %v3749_v56 }
  0x67   :  { %3539 = vmatpush3.bf16.msra.mxu0 %v3634_v44 }
  0x68   :  { %1537 = vmatprep.subr.bf16.mxu0 %v3258_v60  ;;  %v802_v60 = vld [vmem:[#allocation8 + $0x188] sm:$0xff] }
  0x6a   :  { %3541 = vmatmul.mubr.msk.bf16.vlgmr.msra.gmra.mrb[8].mxu0 %vm444_vm0, %v3636_v50  ;;  %v3260_v50 = vcombine.high %v754_v48, %v770_v49 }
  0x6b   :  { %1569 = vmatprep.mubr.bf16.mxu0 %v3748_v0  ;;  %1538 = vmatpush1.bf16.msra.mxu0 %v3257_v59  ;;  %v3290_v59 = vcombine.high %v785_v55, %v801_v57 }
  0x6d   :  { %1539 = vmatprep.subr.bf16.mxu0 %v3290_v59 }
  0xc8   :  { %v161_v61 = vpop.permute.xlu0 %160 }
  0xc9   :  { %v171_v14 = vpop.permute.xlu1 %170 }
  0xcc   :  { %v166_v8 = vpop.permute.xlu0 %165 }
  0xcd   :  { %v176_v26 = vpop.permute.xlu1 %175 }
 0x12d   :  { %v3481_v62 = vpop.f32.mrb[0].mxu0 }
 0x12e   :  { %v3482_v63 = vpop.f32.mrb[1].mxu0  ;;  %v3509_v3 = vpop.f32.mrb[0].mxu1 }
 0x12f   :  { %v3483_v1 = vadd.f32 %v3482_v63, %v3481_v62  ;;  %v3484_v2 = vpop.f32.mrb[2].mxu0  ;;  %v3510_v7 = vpop.f32.mrb[1].mxu1  ;;  %v3291_v62 = vcombine.low %v786_v58, %v802_v60  ;;  %v3292_v63 = vcombine.high %v786_v58, %v802_v60 }
 0x130   :  { %v3485_v4 = vpop.f32.mrb[3].mxu0  ;;  %v3511_v9 = vadd.f32 %v3510_v7, %v3509_v3  ;;  %v3512_v10 = vpop.f32.mrb[2].mxu1 }
 0x131   :  { %v486_v5 = vadd.f32 %v3483_v1, %v161_v61  ;;  %v3486_v6 = vadd.f32 %v3485_v4, %v3484_v2  ;;  %v3513_v12 = vpop.f32.mrb[3].mxu1  ;;  %v3289_v61 = vcombine.low %v785_v55, %v801_v57  ;;  %v817_v1 = vld [vmem:[#allocation8 + $0x200] sm:$0xff]  ;;  %v818_v2 = vld [vmem:[#allocation8 + $0x208] sm:$0xff]  ;;  %v819_v55 = vld [vmem:[#allocation8 + $0x210] sm:$0xff] }
 0x132   :  { %v3514_v13 = vadd.f32 %v3513_v12, %v3512_v10  ;;  %v834_v4 = vld [vmem:[#allocation8 + $0x288] sm:$0xff]  ;;  %v835_v57 = vld [vmem:[#allocation8 + $0x290] sm:$0xff] }
 0x133   :  { %v489_v11 = vadd.f32 %v3486_v6, %v166_v8  ;;  %v535_v15 = vadd.f32 %v3511_v9, %v486_v5  ;;  %1540 = vmatpush1.bf16.msra.mxu0 %v3289_v61  ;;  %v3323_v6 = vcombine.low %v818_v2, %v834_v4  ;;  %v3324_v7 = vcombine.high %v818_v2, %v834_v4  ;;  %v849_v8 = vld [vmem:[#allocation8 + $0x300] sm:$0xff]  ;;  %v850_v10 = vld [vmem:[#allocation8 + $0x308] sm:$0xff]  ;;  %v820_v61 = vld [vmem:[#allocation8 + $0x218] sm:$0xff] }
 0x134   :  { %v865_v9 = vld [vmem:[#allocation8 + $0x380] sm:$0xff]  ;;  %v866_v12 = vld [vmem:[#allocation8 + $0x388] sm:$0xff]  ;;  %v3326_v60 = vcombine.high %v819_v55, %v835_v57  ;;  %v867_v2 = vld [vmem:[#allocation8 + $0x390] sm:$0xff]  ;;  %v3325_v4 = vcombine.low %v819_v55, %v835_v57 }
 0x135   :  { %v3487_v16 = vpop.f32.mrb[4].mxu0  ;;  %v538_v18 = vadd.f32 %v3514_v13, %v489_v11  ;;  %v3354_v11 = vcombine.high %v849_v8, %v865_v9  ;;  %v3353_v13 = vcombine.low %v849_v8, %v865_v9 }
 0x136   :  { %v3488_v17 = vpop.f32.mrb[5].mxu0 }
 0x137   :  { %v3489_v19 = vadd.f32 %v3488_v17, %v3487_v16  ;;  %v3490_v20 = vpop.f32.mrb[6].mxu0  ;;  %v3515_v21 = vpop.f32.mrb[4].mxu1  ;;  %v755_v16 = vld [vmem:[#allocation8 + $0x10] sm:$0xff] }
 0x138   :  { %v3491_v22 = vpop.f32.mrb[7].mxu0  ;;  %v3516_v25 = vpop.f32.mrb[5].mxu1  ;;  %v771_v17 = vld [vmem:[#allocation8 + $0x90] sm:$0xff] }
 0x139   :  { %v494_v23 = vadd.f32 %v3489_v19, %v171_v14  ;;  %v3492_v24 = vadd.f32 %v3491_v22, %v3490_v20  ;;  %v3517_v27 = vadd.f32 %v3516_v25, %v3515_v21  ;;  %v3518_v28 = vpop.f32.mrb[6].mxu1  ;;  %v3355_v14 = vcombine.low %v850_v10, %v866_v12  ;;  %v617_v19 = vpop.permute.xlu0 %616  ;;  %v772_v22 = vld [vmem:[#allocation8 + $0x98] sm:$0xff] }
 0x13a   :  { %v3519_v30 = vpop.f32.mrb[7].mxu1  ;;  %v3262_v21 = vcombine.high %v755_v16, %v771_v17 }
 0x13b   :  { %v497_v29 = vadd.f32 %v3492_v24, %v176_v26  ;;  %v3520_v31 = vadd.f32 %v3519_v30, %v3518_v28  ;;  %v543_v32 = vadd.f32 %v3517_v27, %v494_v23  ;;  %v622_v26 = vpop.permute.xlu1 %621 }
 0x13d   :  { %v3542_v33 = vpop.f32.mrb[8].mxu0  ;;  %v546_v34 = vadd.f32 %v3520_v31, %v497_v29  ;;  %v627_v31 = vpop.permute.xlu0 %626 }
 0x13e   :  { %v592_v35 = vadd.f32 %v3542_v33, %v543_v32  ;;  %v583_v36 = vpop.f32.mrb[9].mxu0 }
 0x13f   :  { %v584_v37 = vadd.f32 %v583_v36, %v535_v15  ;;  %v3543_v38 = vpop.f32.mrb[10].mxu0  ;;  %v3356_v15 = vcombine.high %v850_v10, %v866_v12 }
 0x140   :  { %v595_v39 = vadd.f32 %v3543_v38, %v546_v34  ;;  %v586_v40 = vpop.f32.mrb[11].mxu0  ;;  %v600_v42 = vmax.f32 %v592_v35, 0.0  ;;  %v632_v35 = vpop.permute.xlu1 %631 }
 0x141   :  { %v587_v41 = vadd.f32 %v586_v40, %v538_v18  ;;  %v598_v44 = vmax.f32 %v584_v37, 0.0  ;;  %v756_v18 = vld [vmem:[#allocation8 + $0x18] sm:$0xff]  ;;  %v787_v40 = vld [vmem:[#allocation8 + $0x110] sm:$0xff] }
 0x142   :  { %v601_v43 = vmax.f32 %v595_v39, 0.0  ;;  %v3264_v25 = vcombine.high %v756_v18, %v772_v22 }
 0x143   :  { %v599_v45 = vmax.f32 %v587_v41, 0.0  ;;  %v803_v41 = vld [vmem:[#allocation8 + $0x190] sm:$0xff] }
 0x144   :  { %v608_v46 = vpack.c.bf16 %v601_v43, %v600_v42  ;;  %v788_v42 = vld [vmem:[#allocation8 + $0x118] sm:$0xff]  ;;  %v3294_v48 = vcombine.high %v787_v40, %v803_v41 }
 0x145   :  { %v607_v47 = vpack.c.bf16 %v599_v45, %v598_v44  ;;  %v804_v43 = vld [vmem:[#allocation8 + $0x198] sm:$0xff]  ;;  %v3261_v45 = vcombine.low %v755_v16, %v771_v17 }
 0x146   :  { %v3296_v49 = vcombine.high %v788_v42, %v804_v43  ;;  %v3295_v59 = vcombine.low %v788_v42, %v804_v43  ;;  %v822_v42 = vld [vmem:[#allocation8 + $0x228] sm:$0xff] }
 0x147   :  { %3545 = vmatpush3.bf16.msra.mxu1 %v607_v47  ;;  %v838_v43 = vld [vmem:[#allocation8 + $0x2a8] sm:$0xff] }
 0x148   :  { %3546 = vmatprep.subr.bf16.mxu1 %v3749_v56 }
 0x14b   :  { %3547 = vmatpush3.bf16.msra.mxu1 %v608_v46  ;;  %v3263_v46 = vcombine.low %v756_v18, %v772_v22  ;;  %v774_v18 = vld [vmem:[#allocation8 + $0xa8] sm:$0xff] }
 0x14c   :  { %1620 = vmatprep.subr.bf16.mxu1 %v3260_v50  ;;  %v637_v50 = vpop.permute.xlu0 %636 }
 0x14e   :  { %3549 = vmatmul.mubr.msk.bf16.vlgmr.msra.gmra.mrb[8].mxu1 %vm652_vm2, %v3637_v51 }
 0x14f   :  { %3552 = vmatprep.mubr.msk.bf16.mxu1 %vm3750_vm1, %v3749_v56  ;;  %1621 = vmatpush1.bf16.msra.mxu1 %v3259_v52 }
 0x150   :  { %1622 = vmatprep.subr.bf16.mxu1 %v3292_v63 }
 0x153   :  { %1623 = vmatpush1.bf16.msra.mxu1 %v3291_v62  ;;  %v836_v62 = vld [vmem:[#allocation8 + $0x298] sm:$0xff] }
 0x154   :  { %1624 = vmatprep.subr.bf16.mxu1 %v3324_v7  ;;  %v3327_v8 = vcombine.low %v820_v61, %v836_v62 }
 0x156   :  { %3553 = vmatmul.mubr.msk.bf16.gmra.mrb[12].mxu1 %vm652_vm2, %v3638_v53 }
 0x157   :  { %3556 = vmatprep.mubr.msk.bf16.mxu1 %vm3750_vm1, %v3749_v56  ;;  %v833_v56 = vld [vmem:[#allocation8 + $0x280] sm:$0xff]  ;;  %1625 = vmatpush1.bf16.msra.mxu1 %v3323_v6  ;;  %v868_v6 = vld [vmem:[#allocation8 + $0x398] sm:$0xff] }
 0x158   :  { %v3322_v3 = vcombine.high %v817_v1, %v833_v56  ;;  %v3321_v5 = vcombine.low %v817_v1, %v833_v56  ;;  %1626 = vmatprep.subr.bf16.mxu1 %v3356_v15  ;;  %v851_v56 = vld [vmem:[#allocation8 + $0x310] sm:$0xff]  ;;  %v758_v15 = vld [vmem:[#allocation8 + $0x28] sm:$0xff] }
 0x159   :  { %v3358_v9 = vcombine.high %v851_v56, %v867_v2 }
 0x15a   :  { %1541 = vmatprep.subr.bf16.mxu0 %v3322_v3  ;;  %v852_v3 = vld [vmem:[#allocation8 + $0x318] sm:$0xff] }
 0x15b   :  { %1542 = vmatpush1.bf16.msra.mxu0 %v3321_v5  ;;  %1627 = vmatpush1.bf16.msra.mxu1 %v3355_v14  ;;  %v3328_v5 = vcombine.high %v820_v61, %v836_v62  ;;  %v3360_v10 = vcombine.high %v852_v3, %v868_v6  ;;  %v3359_v12 = vcombine.low %v852_v3, %v868_v6  ;;  %v773_v14 = vld [vmem:[#allocation8 + $0xa0] sm:$0xff]  ;;  %v776_v61 = vld [vmem:[#allocation8 + $0xb8] sm:$0xff]  ;;  %v807_v3 = vld [vmem:[#allocation8 + $0x1b0] sm:$0xff] }
 0x15c   :  { %1543 = vmatprep.subr.bf16.mxu0 %v3354_v11  ;;  %1786 = vmatprep.subr.bf16.mxu1 %v3264_v25  ;;  %v3357_v11 = vcombine.low %v851_v56, %v867_v2  ;;  %v791_v2 = vld [vmem:[#allocation8 + $0x130] sm:$0xff] }
 0x15e   :  { %3557 = vmatmul.mubr.msk.bf16.gmra.mrb[16].mxu1 %vm652_vm2, %v3639_v54  ;;  %v3293_v54 = vcombine.low %v787_v40, %v803_v41  ;;  %v821_v40 = vld [vmem:[#allocation8 + $0x220] sm:$0xff] }
 0x15f   :  { %1652 = vmatprep.mubr.bf16.mxu1 %v3748_v0  ;;  %1544 = vmatpush1.bf16.msra.mxu0 %v3353_v13  ;;  %v757_v13 = vld [vmem:[#allocation8 + $0x20] sm:$0xff] }
 0x160   :  { %1703 = vmatprep.subr.bf16.mxu0 %v3262_v21  ;;  %v3265_v16 = vcombine.low %v757_v13, %v773_v14  ;;  %v3266_v17 = vcombine.high %v757_v13, %v773_v14  ;;  %v837_v41 = vld [vmem:[#allocation8 + $0x2a0] sm:$0xff]  ;;  %v824_v13 = vld [vmem:[#allocation8 + $0x238] sm:$0xff] }
 0x161   :  { %v840_v14 = vld [vmem:[#allocation8 + $0x2b8] sm:$0xff] }
 0x221   :  { %v696_v20 = vpop.f32.mrb[8].mxu1 }
 0x222   :  { %v697_v23 = vadd.f32 %v696_v20, %v617_v19  ;;  %v3550_v24 = vpop.f32.mrb[9].mxu1  ;;  %v3267_v19 = vcombine.low %v758_v15, %v774_v18  ;;  %v3268_v20 = vcombine.high %v758_v15, %v774_v18  ;;  %v3301_v15 = vcombine.low %v791_v2, %v807_v3 }
 0x223   :  { %v699_v27 = vpop.f32.mrb[10].mxu1  ;;  %v3336_v18 = vcombine.high %v824_v13, %v840_v14 }
 0x224   :  { %v700_v28 = vadd.f32 %v699_v27, %v622_v26  ;;  %723 = vrot.lane.b32.xlu1 %v697_v23, %s3743_s1  ;;  %v3551_v29 = vpop.f32.mrb[11].mxu1 }
 0x226   :  { %v738_v30 = vpack.c.bf16 %v700_v28, %v697_v23 }
 0x228   :  { %743 = vst.msk [vmem:[#allocation2] sm:$0xff] %vm444_vm0, %v738_v30 }
 0x229   :  { %v704_v32 = vpop.f32.mrb[12].mxu1 }
 0x22a   :  { %v705_v33 = vadd.f32 %v704_v32, %v627_v31  ;;  %v3554_v34 = vpop.f32.mrb[13].mxu1 }
 0x22b   :  { %v707_v36 = vpop.f32.mrb[14].mxu1  ;;  %v789_v34 = vld [vmem:[#allocation8 + $0x120] sm:$0xff] }
 0x22c   :  { %v708_v37 = vadd.f32 %v707_v36, %v632_v35  ;;  %v3577_v38 = vpack.i.bf16 %v705_v33, %v700_v28  ;;  %v3555_v39 = vpop.f32.mrb[15].mxu1  ;;  %v805_v35 = vld [vmem:[#allocation8 + $0x1a0] sm:$0xff]  ;;  %v790_v36 = vld [vmem:[#allocation8 + $0x128] sm:$0xff] }
 0x22e   :  { %v739_v44 = vpack.c.bf16 %v708_v37, %v705_v33  ;;  %3578 = vrot.lane.b32.xlu0 %v3577_v38, %s3743_s1  ;;  %v3298_v38 = vcombine.high %v789_v34, %v805_v35 }
 0x22f   :  { %v3880_v47 = vld [vmem:[#allocation2] sm:$0xff] }
 0x230   :  { %744 = vst.msk [vmem:[#allocation2 + $0x8] sm:$0xff] %vm444_vm0, %v739_v44  ;;  %3385 = vmatmul.mubr.msk.bf16.vlgmr.msra.gmra.mrb[12].mxu0 %vm444_vm0, %v3880_v47  ;;  %3390 = vmatmul.mubr.msk.bf16.vlgmr.msra.gmra.mrb[20].mxu1 %vm444_vm0, %v3880_v47  ;;  %v3297_v44 = vcombine.low %v789_v34, %v805_v35 }
 0x231   :  { %v712_v51 = vpop.f32.mrb[16].mxu1  ;;  %1579 = vmatprep.mubr.bf16.mxu0 %v3748_v0  ;;  %1662 = vmatprep.mubr.bf16.mxu1 %v3748_v0 }
 0x232   :  { %v713_v52 = vadd.f32 %v712_v51, %v637_v50  ;;  %v3558_v53 = vpop.f32.mrb[17].mxu1  ;;  %1704 = vmatpush1.bf16.msra.mxu0 %v3261_v45  ;;  %1787 = vmatpush1.bf16.msra.mxu1 %v3263_v46  ;;  %v3330_v46 = vcombine.high %v821_v40, %v837_v41  ;;  %v869_v50 = vld [vmem:[#allocation8 + $0x3a0] sm:$0xff]  ;;  %v854_v51 = vld [vmem:[#allocation8 + $0x328] sm:$0xff] }
 0x233   :  { %v715_v58 = vpop.f32.mrb[18].mxu1  ;;  %1705 = vmatprep.subr.bf16.mxu0 %v3294_v48  ;;  %1788 = vmatprep.subr.bf16.mxu1 %v3296_v49  ;;  %v3332_v48 = vcombine.high %v822_v42, %v838_v43  ;;  %v853_v49 = vld [vmem:[#allocation8 + $0x320] sm:$0xff]  ;;  %v3329_v53 = vcombine.low %v821_v40, %v837_v41 }
 0x234   :  { %v3582_v63 = vpack.i.bf16 %v713_v52, %v708_v37  ;;  %v3559_v1 = vpop.f32.mrb[19].mxu1  ;;  %v806_v37 = vld [vmem:[#allocation8 + $0x1a8] sm:$0xff]  ;;  %v3362_v55 = vcombine.high %v853_v49, %v869_v50  ;;  %v759_v58 = vld [vmem:[#allocation8 + $0x30] sm:$0xff]  ;;  %v3361_v62 = vcombine.low %v853_v49, %v869_v50 }
 0x235   :  { %v3300_v39 = vcombine.high %v790_v36, %v806_v37  ;;  %v3299_v45 = vcombine.low %v790_v36, %v806_v37  ;;  %v794_v49 = vld [vmem:[#allocation8 + $0x148] sm:$0xff] }
 0x236   :  { %3583 = vrot.lane.b32.xlu1 %v3582_v63, %s3743_s1  ;;  %1706 = vmatpush1.bf16.msra.mxu0 %v3293_v54  ;;  %v3331_v54 = vcombine.low %v822_v42, %v838_v43  ;;  %v810_v50 = vld [vmem:[#allocation8 + $0x1c8] sm:$0xff]  ;;  %s3190_s1 = sshll.u32 %s3751_s3, 4  ;;  %s3191_s1 = int_to_ptr.vmem [resolvable:$true] %s3190_s1 }
 0x237   :  { %v3890_v7 = vld [vmem:[#allocation2 + $0x8] sm:$0xff]  ;;  %1789 = vmatpush1.bf16.msra.mxu1 %v3295_v59  ;;  %1707 = vmatprep.subr.bf16.mxu0 %v3326_v60  ;;  %v760_v60 = vld [vmem:[#allocation8 + $0x38] sm:$0xff]  ;;  %s3711_s0 = scalar_lea.vmem %s3191_s1, 40960  ;;  %p3716_p11 = scmp.lt.s32.totalorder %s3191_s1, %s3191_s1 }
 0x238   :  { %3386 = vmatmul.mubr.msk.bf16.gmra.mrb[16].mxu0 %vm444_vm0, %v3890_v7  ;;  %3391 = vmatmul.mubr.msk.bf16.gmra.mrb[24].mxu1 %vm444_vm0, %v3890_v7  ;;  %v775_v59 = vld [vmem:[#allocation8 + $0xb0] sm:$0xff]  ;;  %v3272_v56 = vcombine.high %v760_v60, %v776_v61  ;;  %p3712_p10 = scmp.ne.s32.totalorder %s3191_s1, %s3711_s0  ;;  %p3717_p12 = scmp.lt.s32.totalorder %s3711_s0, %s3711_s0 }
 0x239   :  { %1589 = vmatprep.mubr.bf16.mxu0 %v3748_v0  ;;  %1672 = vmatprep.mubr.bf16.mxu1 %v3748_v0  ;;  %v3270_v1 = vcombine.high %v759_v58, %v775_v59  ;;  %v3269_v6 = vcombine.low %v759_v58, %v775_v59  ;;  %v3308_v59 = vcombine.high %v794_v49, %v810_v50 }
 0x23a   :  { %1790 = vmatprep.subr.bf16.mxu1 %v3328_v5  ;;  %1708 = vmatpush1.bf16.msra.mxu0 %v3325_v4  ;;  %v792_v4 = vld [vmem:[#allocation8 + $0x138] sm:$0xff]  ;;  %p3718_p13 = por %p3717_p12, %p3716_p11 }
 0x23b   :  { %1791 = vmatpush1.bf16.msra.mxu1 %v3327_v8  ;;  %1709 = vmatprep.subr.bf16.mxu0 %v3358_v9  ;;  %v808_v5 = vld [vmem:[#allocation8 + $0x1b8] sm:$0xff]  ;;  %v3271_v8 = vcombine.low %v760_v60, %v776_v61  ;;  %v3302_v9 = vcombine.high %v791_v2, %v807_v3  ;;  %v825_v60 = vld [vmem:[#allocation8 + $0x240] sm:$0xff] }
 0x23c   :  { %1792 = vmatprep.subr.bf16.mxu1 %v3360_v10  ;;  %v3304_v10 = vcombine.high %v792_v4, %v808_v5  ;;  %p3719_p0 = pnand %p3718_p13, %p3712_p10 }
 0x23e   :  { %1710 = vmatpush1.bf16.msra.mxu0 %v3357_v11  ;;  %v823_v11 = vld [vmem:[#allocation8 + $0x230] sm:$0xff] }
 0x23f   :  { %1793 = vmatpush1.bf16.msra.mxu1 %v3359_v12  ;;  %1869 = vmatprep.subr.bf16.mxu0 %v3266_v17  ;;  %v839_v12 = vld [vmem:[#allocation8 + $0x2b0] sm:$0xff] }
 0x240   :  { %1952 = vmatprep.subr.bf16.mxu1 %v3268_v20  ;;  %v3334_v17 = vcombine.high %v823_v11, %v839_v12  ;;  %v871_v20 = vld [vmem:[#allocation8 + $0x3b0] sm:$0xff] }
 0x296   :  { %v724_v21 = vpop.permute.xlu1 %723 }
 0x297   :  { %v740_v22 = vpack.c.bf16 %v724_v21, %v713_v52  ;;  %v870_v52 = vld [vmem:[#allocation8 + $0x3a8] sm:$0xff]  ;;  %v856_v21 = vld [vmem:[#allocation8 + $0x338] sm:$0xff] }
 0x298   :  { %v3364_v57 = vcombine.high %v854_v51, %v870_v52  ;;  %v3363_v63 = vcombine.low %v854_v51, %v870_v52 }
 0x299   :  { %745 = vst.msk [vmem:[#allocation2 + $0x10] sm:$0xff] %vm444_vm0, %v740_v22  ;;  %v872_v22 = vld [vmem:[#allocation8 + $0x3b8] sm:$0xff] }
 0x29a   :  { %v3367_v35 = vcombine.low %v856_v21, %v872_v22 }
 0x2a0   :  { %v3899_v23 = vld [vmem:[#allocation2 + $0x10] sm:$0xff]  ;;  %v3579_v24 = vpop.permute.xlu0 %3578 }
 0x2a1   :  { %v3581_v25 = vunpack.i.h.bf16 %v3579_v24  ;;  %v3580_v26 = vunpack.i.l.bf16 %v3579_v24  ;;  %3387 = vmatmul.mubr.msk.bf16.gmra.mrb[20].mxu0 %vm444_vm0, %v3899_v23  ;;  %3392 = vmatmul.mubr.msk.bf16.gmra.mrb[28].mxu1 %vm444_vm0, %v3899_v23  ;;  %v3333_v24 = vcombine.low %v823_v11, %v839_v12  ;;  %v858_v11 = vld [vmem:[#allocation8 + $0x348] sm:$0xff] }
 0x2a2   :  { %1599 = vmatprep.mubr.bf16.mxu0 %v3748_v0  ;;  %1682 = vmatprep.mubr.bf16.mxu1 %v3748_v0  ;;  %v874_v12 = vld [vmem:[#allocation8 + $0x3c8] sm:$0xff] }
 0x2a3   :  { %v741_v27 = vpack.c.bf16 %v3581_v25, %v3580_v26  ;;  %v3335_v25 = vcombine.low %v824_v13, %v840_v14 }
 0x2a5   :  { %746 = vst.msk [vmem:[#allocation2 + $0x18] sm:$0xff] %vm444_vm0, %v741_v27  ;;  %v3368_v27 = vcombine.high %v856_v21, %v872_v22  ;;  %v3371_v22 = vcombine.low %v858_v11, %v874_v12 }
 0x2a8   :  { %v3584_v28 = vpop.permute.xlu1 %3583 }
 0x2a9   :  { %v3586_v29 = vunpack.i.h.bf16 %v3584_v28  ;;  %v3585_v30 = vunpack.i.l.bf16 %v3584_v28  ;;  %v3961_v28 = vld [vmem:[#allocation8 + $0x40] sm:$0xff] }
 0x2ab   :  { %v742_v31 = vpack.c.bf16 %v3586_v29, %v3585_v30  ;;  %v3967_v29 = vld [vmem:[#allocation8 + $0xc0] sm:$0xff]  ;;  %v3969_v30 = vld [vmem:[#allocation8 + $0x48] sm:$0xff] }
 0x2ac   :  { %v3908_v32 = vld [vmem:[#allocation2 + $0x18] sm:$0xff]  ;;  %v3274_v36 = vcombine.high %v3961_v28, %v3967_v29 }
 0x2ad   :  { %747 = vst.msk [vmem:[#allocation2 + $0x20] sm:$0xff] %vm444_vm0, %v742_v31  ;;  %3388 = vmatmul.mubr.msk.bf16.gmra.mrb[24].mxu0 %vm444_vm0, %v3908_v32  ;;  %3393 = vmatmul.mubr.msk.bf16.gmra.mrb[32].mxu1 %vm444_vm0, %v3908_v32  ;;  %v3971_v31 = vld [vmem:[#allocation8 + $0xc8] sm:$0xff] }
 0x2ae   :  { %1609 = vmatprep.mubr.bf16.mxu0 %v3748_v0  ;;  %1692 = vmatprep.mubr.bf16.mxu1 %v3748_v0  ;;  %v3276_v37 = vcombine.high %v3969_v30, %v3971_v31 }
 0x2b4   :  { %v3917_v33 = vld [vmem:[#allocation2 + $0x20] sm:$0xff] }
 0x2b5   :  { %3389 = vmatmul.mubr.msk.bf16.gmra.mrb[28].mxu0 %vm444_vm0, %v3917_v33  ;;  %3394 = vmatmul.mubr.msk.bf16.gmra.mrb[36].mxu1 %vm444_vm0, %v3917_v33 }
 0x2b6   :  { %1735 = vmatprep.mubr.bf16.mxu0 %v3748_v0  ;;  %1818 = vmatprep.mubr.bf16.mxu1 %v3748_v0 }
 0x2bd   :  { %3395 = vmatmul.mubr.msk.bf16.vlgmr.msra.gmra.mrb[32].mxu0 %vm444_vm0, %v3880_v47  ;;  %3400 = vmatmul.mubr.msk.bf16.vlgmr.msra.gmra.mrb[40].mxu1 %vm444_vm0, %v3880_v47 }
 0x2be   :  { %1745 = vmatprep.mubr.bf16.mxu0 %v3748_v0  ;;  %1828 = vmatprep.mubr.bf16.mxu1 %v3748_v0 }
 0x2bf   :  { %1870 = vmatpush1.bf16.msra.mxu0 %v3265_v16  ;;  %1953 = vmatpush1.bf16.msra.mxu1 %v3267_v19  ;;  %v3303_v16 = vcombine.low %v792_v4, %v808_v5  ;;  %v855_v19 = vld [vmem:[#allocation8 + $0x330] sm:$0xff]  ;;  %v3307_v5 = vcombine.low %v794_v49, %v810_v50 }
 0x2c0   :  { %1871 = vmatprep.subr.bf16.mxu0 %v3298_v38  ;;  %1954 = vmatprep.subr.bf16.mxu1 %v3300_v39  ;;  %v3366_v26 = vcombine.high %v855_v19, %v871_v20  ;;  %v3365_v34 = vcombine.low %v855_v19, %v871_v20  ;;  %v764_v19 = vld [vmem:[#allocation8 + $0x58] sm:$0xff] }
 0x2c1   :  { %v780_v20 = vld [vmem:[#allocation8 + $0xd8] sm:$0xff] }
 0x2c3   :  { %1872 = vmatpush1.bf16.msra.mxu0 %v3297_v44  ;;  %1955 = vmatpush1.bf16.msra.mxu1 %v3299_v45 }
 0x2c4   :  { %1873 = vmatprep.subr.bf16.mxu0 %v3330_v46  ;;  %1956 = vmatprep.subr.bf16.mxu1 %v3332_v48  ;;  %v793_v46 = vld [vmem:[#allocation8 + $0x140] sm:$0xff] }
 0x2c5   :  { %3396 = vmatmul.mubr.msk.bf16.gmra.mrb[36].mxu0 %vm444_vm0, %v3890_v7  ;;  %3401 = vmatmul.mubr.msk.bf16.gmra.mrb[44].mxu1 %vm444_vm0, %v3890_v7  ;;  %v809_v48 = vld [vmem:[#allocation8 + $0x1c0] sm:$0xff] }
 0x2c6   :  { %1755 = vmatprep.mubr.bf16.mxu0 %v3748_v0  ;;  %1838 = vmatprep.mubr.bf16.mxu1 %v3748_v0  ;;  %v3306_v58 = vcombine.high %v793_v46, %v809_v48  ;;  %v3305_v4 = vcombine.low %v793_v46, %v809_v48  ;;  %v860_v46 = vld [vmem:[#allocation8 + $0x358] sm:$0xff] }
 0x2c7   :  { %1874 = vmatpush1.bf16.msra.mxu0 %v3329_v53  ;;  %1957 = vmatpush1.bf16.msra.mxu1 %v3331_v54  ;;  %v3273_v53 = vcombine.low %v3961_v28, %v3967_v29  ;;  %v3275_v54 = vcombine.low %v3969_v30, %v3971_v31  ;;  %v796_v28 = vld [vmem:[#allocation8 + $0x158] sm:$0xff]  ;;  %v3279_v31 = vcombine.low %v764_v19, %v780_v20 }
 0x2c8   :  { %1875 = vmatprep.subr.bf16.mxu0 %v3362_v55  ;;  %1958 = vmatprep.subr.bf16.mxu1 %v3364_v57  ;;  %v812_v29 = vld [vmem:[#allocation8 + $0x1d8] sm:$0xff] }
 0x2c9   :  { %v876_v48 = vld [vmem:[#allocation8 + $0x3d8] sm:$0xff] }
 0x2cb   :  { %1876 = vmatpush1.bf16.msra.mxu0 %v3361_v62  ;;  %1959 = vmatpush1.bf16.msra.mxu1 %v3363_v63  ;;  %v841_v63 = vld [vmem:[#allocation8 + $0x2c0] sm:$0xff] }
 0x2cc   :  { %2035 = vmatprep.subr.bf16.mxu0 %v3270_v1  ;;  %2118 = vmatprep.subr.bf16.mxu1 %v3272_v56  ;;  %v826_v1 = vld [vmem:[#allocation8 + $0x248] sm:$0xff]  ;;  %v3337_v13 = vcombine.low %v825_v60, %v841_v63 }
 0x2cd   :  { %3397 = vmatmul.mubr.msk.bf16.gmra.mrb[40].mxu0 %vm444_vm0, %v3899_v23  ;;  %3402 = vmatmul.mubr.msk.bf16.gmra.mrb[48].mxu1 %vm444_vm0, %v3899_v23  ;;  %v842_v56 = vld [vmem:[#allocation8 + $0x2c8] sm:$0xff] }
 0x2ce   :  { %1765 = vmatprep.mubr.bf16.mxu0 %v3748_v0  ;;  %1848 = vmatprep.mubr.bf16.mxu1 %v3748_v0  ;;  %v3339_v14 = vcombine.low %v826_v1, %v842_v56 }
 0x2d5   :  { %3398 = vmatmul.mubr.msk.bf16.gmra.mrb[44].mxu0 %vm444_vm0, %v3908_v32  ;;  %3403 = vmatmul.mubr.msk.bf16.gmra.mrb[52].mxu1 %vm444_vm0, %v3908_v32 }
 0x2d6   :  { %1775 = vmatprep.mubr.bf16.mxu0 %v3748_v0  ;;  %1858 = vmatprep.mubr.bf16.mxu1 %v3748_v0 }
 0x2dd   :  { %3399 = vmatmul.mubr.msk.bf16.gmra.mrb[48].mxu0 %vm444_vm0, %v3917_v33  ;;  %3404 = vmatmul.mubr.msk.bf16.gmra.mrb[56].mxu1 %vm444_vm0, %v3917_v33 }
 0x2de   :  { %1901 = vmatprep.mubr.bf16.mxu0 %v3748_v0  ;;  %1984 = vmatprep.mubr.bf16.mxu1 %v3748_v0 }
 0x2e5   :  { %3405 = vmatmul.mubr.msk.bf16.vlgmr.msra.gmra.mrb[52].mxu0 %vm444_vm0, %v3880_v47  ;;  %3410 = vmatmul.mubr.msk.bf16.vlgmr.msra.gmra.mrb[60].mxu1 %vm444_vm0, %v3880_v47 }
 0x2e6   :  { %1911 = vmatprep.mubr.bf16.mxu0 %v3748_v0  ;;  %1994 = vmatprep.mubr.bf16.mxu1 %v3748_v0 }
 0x2e7   :  { %2036 = vmatpush1.bf16.msra.mxu0 %v3269_v6  ;;  %2119 = vmatpush1.bf16.msra.mxu1 %v3271_v8  ;;  %v3338_v6 = vcombine.high %v825_v60, %v841_v63  ;;  %v3340_v8 = vcombine.high %v826_v1, %v842_v56  ;;  %v813_v63 = vld [vmem:[#allocation8 + $0x1e0] sm:$0xff]  ;;  %v798_v1 = vld [vmem:[#allocation8 + $0x168] sm:$0xff] }
 0x2e8   :  { %2037 = vmatprep.subr.bf16.mxu0 %v3302_v9  ;;  %2120 = vmatprep.subr.bf16.mxu1 %v3304_v10  ;;  %v857_v9 = vld [vmem:[#allocation8 + $0x340] sm:$0xff]  ;;  %v814_v56 = vld [vmem:[#allocation8 + $0x1e8] sm:$0xff] }
 0x2e9   :  { %v873_v10 = vld [vmem:[#allocation8 + $0x3c0] sm:$0xff] }
 0x2ea   :  { %v3369_v21 = vcombine.low %v857_v9, %v873_v10 }
 0x2eb   :  { %2038 = vmatpush1.bf16.msra.mxu0 %v3301_v15  ;;  %2121 = vmatpush1.bf16.msra.mxu1 %v3303_v16  ;;  %v3370_v15 = vcombine.high %v857_v9, %v873_v10  ;;  %v3372_v16 = vcombine.high %v858_v11, %v874_v12  ;;  %v830_v9 = vld [vmem:[#allocation8 + $0x268] sm:$0xff]  ;;  %v3315_v12 = vcombine.low %v798_v1, %v814_v56 }
 0x2ec   :  { %2039 = vmatprep.subr.bf16.mxu0 %v3334_v17  ;;  %2122 = vmatprep.subr.bf16.mxu1 %v3336_v18  ;;  %v763_v17 = vld [vmem:[#allocation8 + $0x50] sm:$0xff]  ;;  %v846_v10 = vld [vmem:[#allocation8 + $0x2e8] sm:$0xff] }
 0x2ed   :  { %3406 = vmatmul.mubr.msk.bf16.gmra.mrb[56].mxu0 %vm444_vm0, %v3890_v7  ;;  %3411 = vmatmul.mubr.msk.bf16.gmra.mrb[64].mxu1 %vm444_vm0, %v3890_v7  ;;  %v779_v18 = vld [vmem:[#allocation8 + $0xd0] sm:$0xff] }
 0x2ee   :  { %1921 = vmatprep.mubr.bf16.mxu0 %v3748_v0  ;;  %2004 = vmatprep.mubr.bf16.mxu1 %v3748_v0  ;;  %v3277_v30 = vcombine.low %v763_v17, %v779_v18 }
 0x2ef   :  { %2040 = vmatpush1.bf16.msra.mxu0 %v3333_v24  ;;  %2123 = vmatpush1.bf16.msra.mxu1 %v3335_v25  ;;  %v3278_v24 = vcombine.high %v763_v17, %v779_v18  ;;  %v3280_v25 = vcombine.high %v764_v19, %v780_v20  ;;  %v862_v17 = vld [vmem:[#allocation8 + $0x368] sm:$0xff]  ;;  %v3347_v20 = vcombine.low %v830_v9, %v846_v10 }
 0x2f0   :  { %2041 = vmatprep.subr.bf16.mxu0 %v3366_v26  ;;  %2124 = vmatprep.subr.bf16.mxu1 %v3368_v27  ;;  %v795_v26 = vld [vmem:[#allocation8 + $0x150] sm:$0xff]  ;;  %v878_v18 = vld [vmem:[#allocation8 + $0x3e8] sm:$0xff] }
 0x2f1   :  { %v811_v27 = vld [vmem:[#allocation8 + $0x1d0] sm:$0xff] }
 0x2f3   :  { %2042 = vmatpush1.bf16.msra.mxu0 %v3365_v34  ;;  %2125 = vmatpush1.bf16.msra.mxu1 %v3367_v35  ;;  %v3310_v34 = vcombine.high %v795_v26, %v811_v27  ;;  %v3312_v35 = vcombine.high %v796_v28, %v812_v29 }
 0x2f4   :  { %2201 = vmatprep.subr.bf16.mxu0 %v3274_v36  ;;  %2284 = vmatprep.subr.bf16.mxu1 %v3276_v37  ;;  %v827_v36 = vld [vmem:[#allocation8 + $0x250] sm:$0xff] }
 0x2f5   :  { %3407 = vmatmul.mubr.msk.bf16.gmra.mrb[60].mxu0 %vm444_vm0, %v3899_v23  ;;  %3412 = vmatmul.mubr.msk.bf16.gmra.mrb[68].mxu1 %vm444_vm0, %v3899_v23  ;;  %v843_v37 = vld [vmem:[#allocation8 + $0x2d0] sm:$0xff] }
 0x2f6   :  { %1931 = vmatprep.mubr.bf16.mxu0 %v3748_v0  ;;  %2014 = vmatprep.mubr.bf16.mxu1 %v3748_v0  ;;  %v3341_v49 = vcombine.low %v827_v36, %v843_v37 }
 0x2fd   :  { %3408 = vmatmul.mubr.msk.bf16.gmra.mrb[64].mxu0 %vm444_vm0, %v3908_v32  ;;  %3413 = vmatmul.mubr.msk.bf16.gmra.mrb[72].mxu1 %vm444_vm0, %v3908_v32 }
 0x2fe   :  { %1941 = vmatprep.mubr.bf16.mxu0 %v3748_v0  ;;  %2024 = vmatprep.mubr.bf16.mxu1 %v3748_v0 }
 0x303   :  { %v1571_v38 = vpop.f32.mrb[12].mxu0  ;;  %v1654_v39 = vpop.f32.mrb[20].mxu1 }
 0x304   :  { %2865 = vst [vmem:[#allocation9] sm:$0xff] %v1571_v38  ;;  %2867 = vst [vmem:[#allocation9 + $0x10] sm:$0xff] %v1654_v39  ;;  %v1573_v40 = vpop.f32.mrb[13].mxu0  ;;  %v1656_v41 = vpop.f32.mrb[21].mxu1  ;;  %v828_v38 = vld [vmem:[#allocation8 + $0x258] sm:$0xff] }
 0x305   :  { %2866 = vst [vmem:[#allocation9 + $0x8] sm:$0xff] %v1573_v40  ;;  %2868 = vst [vmem:[#allocation9 + $0x18] sm:$0xff] %v1656_v41  ;;  %v1575_v42 = vpop.f32.mrb[14].mxu0  ;;  %v1658_v43 = vpop.f32.mrb[22].mxu1  ;;  %3409 = vmatmul.mubr.msk.bf16.gmra.mrb[68].mxu0 %vm444_vm0, %v3917_v33  ;;  %3414 = vmatmul.mubr.msk.bf16.gmra.mrb[76].mxu1 %vm444_vm0, %v3917_v33  ;;  %v844_v39 = vld [vmem:[#allocation8 + $0x2d8] sm:$0xff]  ;;  %v3309_v40 = vcombine.low %v795_v26, %v811_v27  ;;  %v3311_v41 = vcombine.low %v796_v28, %v812_v29 }
 0x306   :  { %2897 = vst [vmem:[#allocation9 + $0x100] sm:$0xff] %v1575_v42  ;;  %2899 = vst [vmem:[#allocation9 + $0x110] sm:$0xff] %v1658_v43  ;;  %v1577_v44 = vpop.f32.mrb[15].mxu0  ;;  %v1660_v45 = vpop.f32.mrb[23].mxu1  ;;  %2067 = vmatprep.mubr.bf16.mxu0 %v3748_v0  ;;  %2150 = vmatprep.mubr.bf16.mxu1 %v3748_v0  ;;  %v3342_v42 = vcombine.high %v827_v36, %v843_v37  ;;  %v3344_v43 = vcombine.high %v828_v38, %v844_v39  ;;  %v4075_v26 = vld [vmem:[#allocation8 + $0x78] sm:$0xff] }
 0x307   :  { %2898 = vst [vmem:[#allocation9 + $0x108] sm:$0xff] %v1577_v44  ;;  %2900 = vst [vmem:[#allocation9 + $0x118] sm:$0xff] %v1660_v45  ;;  %v859_v44 = vld [vmem:[#allocation8 + $0x350] sm:$0xff]  ;;  %v3343_v50 = vcombine.low %v828_v38, %v844_v39  ;;  %v4077_v27 = vld [vmem:[#allocation8 + $0xf8] sm:$0xff]  ;;  %v3379_v29 = vcombine.low %v862_v17, %v878_v18 }
 0x308   :  { %v875_v45 = vld [vmem:[#allocation8 + $0x3d0] sm:$0xff] }
 0x30b   :  { %v1581_v51 = vpop.f32.mrb[16].mxu0  ;;  %v1664_v52 = vpop.f32.mrb[24].mxu1 }
 0x30c   :  { %2929 = vst [vmem:[#allocation9 + $0x200] sm:$0xff] %v1581_v51  ;;  %2931 = vst [vmem:[#allocation9 + $0x210] sm:$0xff] %v1664_v52  ;;  %v1583_v55 = vpop.f32.mrb[17].mxu0  ;;  %v1666_v57 = vpop.f32.mrb[25].mxu1  ;;  %v3374_v51 = vcombine.high %v859_v44, %v875_v45  ;;  %v3376_v52 = vcombine.high %v860_v46, %v876_v48 }
 0x30d   :  { %2930 = vst [vmem:[#allocation9 + $0x208] sm:$0xff] %v1583_v55  ;;  %2932 = vst [vmem:[#allocation9 + $0x218] sm:$0xff] %v1666_v57  ;;  %v1585_v61 = vpop.f32.mrb[18].mxu0  ;;  %v1668_v62 = vpop.f32.mrb[26].mxu1  ;;  %3415 = vmatmul.mubr.msk.bf16.vlgmr.msra.gmra.mrb[72].mxu0 %vm444_vm0, %v3880_v47  ;;  %3420 = vmatmul.mubr.msk.bf16.vlgmr.msra.gmra.mrb[80].mxu1 %vm444_vm0, %v3880_v47  ;;  %v766_v55 = vld [vmem:[#allocation8 + $0x68] sm:$0xff] }
 0x30e   :  { %2961 = vst [vmem:[#allocation9 + $0x300] sm:$0xff] %v1585_v61  ;;  %2963 = vst [vmem:[#allocation9 + $0x310] sm:$0xff] %v1668_v62  ;;  %v1587_v2 = vpop.f32.mrb[19].mxu0  ;;  %v1670_v3 = vpop.f32.mrb[27].mxu1  ;;  %2077 = vmatprep.mubr.bf16.mxu0 %v3748_v0  ;;  %2160 = vmatprep.mubr.bf16.mxu1 %v3748_v0  ;;  %v782_v57 = vld [vmem:[#allocation8 + $0xe8] sm:$0xff]  ;;  %v797_v62 = vld [vmem:[#allocation8 + $0x160] sm:$0xff] }
 0x30f   :  { %2962 = vst [vmem:[#allocation9 + $0x308] sm:$0xff] %v1587_v2  ;;  %2964 = vst [vmem:[#allocation9 + $0x318] sm:$0xff] %v1670_v3  ;;  %2202 = vmatpush1.bf16.msra.mxu0 %v3273_v53  ;;  %2285 = vmatpush1.bf16.msra.mxu1 %v3275_v54  ;;  %v765_v53 = vld [vmem:[#allocation8 + $0x60] sm:$0xff]  ;;  %v3284_v61 = vcombine.high %v766_v55, %v782_v57  ;;  %v3283_v3 = vcombine.low %v766_v55, %v782_v57 }
 0x310   :  { %2203 = vmatprep.subr.bf16.mxu0 %v3306_v58  ;;  %2286 = vmatprep.subr.bf16.mxu1 %v3308_v59  ;;  %v781_v54 = vld [vmem:[#allocation8 + $0xe0] sm:$0xff]  ;;  %v3373_v58 = vcombine.low %v859_v44, %v875_v45  ;;  %v3375_v59 = vcombine.low %v860_v46, %v876_v48  ;;  %v3313_v11 = vcombine.low %v797_v62, %v813_v63  ;;  %v815_v46 = vld [vmem:[#allocation8 + $0x1f0] sm:$0xff]  ;;  %v800_v48 = vld [vmem:[#allocation8 + $0x178] sm:$0xff] }
 0x311   :  { %v3282_v60 = vcombine.high %v765_v53, %v781_v54  ;;  %v3281_v2 = vcombine.low %v765_v53, %v781_v54  ;;  %v3287_v54 = vcombine.low %v4075_v26, %v4077_v27 }
 0x313   :  { %2204 = vmatpush1.bf16.msra.mxu0 %v3305_v4  ;;  %2287 = vmatpush1.bf16.msra.mxu1 %v3307_v5  ;;  %v3314_v4 = vcombine.high %v797_v62, %v813_v63  ;;  %v3316_v5 = vcombine.high %v798_v1, %v814_v56 }
 0x314   :  { %2205 = vmatprep.subr.bf16.mxu0 %v3338_v6  ;;  %2288 = vmatprep.subr.bf16.mxu1 %v3340_v8  ;;  %v829_v6 = vld [vmem:[#allocation8 + $0x260] sm:$0xff] }
 0x315   :  { %3416 = vmatmul.mubr.msk.bf16.gmra.mrb[76].mxu0 %vm444_vm0, %v3890_v7  ;;  %3421 = vmatmul.mubr.msk.bf16.gmra.mrb[84].mxu1 %vm444_vm0, %v3890_v7  ;;  %v845_v8 = vld [vmem:[#allocation8 + $0x2e0] sm:$0xff] }
 0x316   :  { %2087 = vmatprep.mubr.bf16.mxu0 %v3748_v0  ;;  %2170 = vmatprep.mubr.bf16.mxu1 %v3748_v0  ;;  %v3345_v19 = vcombine.low %v829_v6, %v845_v8 }
 0x317   :  { %2206 = vmatpush1.bf16.msra.mxu0 %v3337_v13  ;;  %2289 = vmatpush1.bf16.msra.mxu1 %v3339_v14  ;;  %v3346_v13 = vcombine.high %v829_v6, %v845_v8  ;;  %v3348_v14 = vcombine.high %v830_v9, %v846_v10  ;;  %v879_v6 = vld [vmem:[#allocation8 + $0x3f0] sm:$0xff]  ;;  %v864_v8 = vld [vmem:[#allocation8 + $0x378] sm:$0xff] }
 0x318   :  { %2207 = vmatprep.subr.bf16.mxu0 %v3370_v15  ;;  %2290 = vmatprep.subr.bf16.mxu1 %v3372_v16  ;;  %v861_v15 = vld [vmem:[#allocation8 + $0x360] sm:$0xff]  ;;  %v880_v9 = vld [vmem:[#allocation8 + $0x3f8] sm:$0xff] }
 0x319   :  { %v877_v16 = vld [vmem:[#allocation8 + $0x3e0] sm:$0xff] }
 0x31a   :  { %v3377_v28 = vcombine.low %v861_v15, %v877_v16 }
 0x31b   :  { %2208 = vmatpush1.bf16.msra.mxu0 %v3369_v21  ;;  %2291 = vmatpush1.bf16.msra.mxu1 %v3371_v22  ;;  %v3378_v21 = vcombine.high %v861_v15, %v877_v16  ;;  %v3380_v22 = vcombine.high %v862_v17, %v878_v18  ;;  %v3384_v17 = vcombine.high %v864_v8, %v880_v9  ;;  %v4115_v18 = vld [vmem:[#allocation2 + $0x8] sm:$0xff] }
 0x31c   :  { %2367 = vmatprep.subr.bf16.mxu0 %v3278_v24  ;;  %2450 = vmatprep.subr.bf16.mxu1 %v3280_v25  ;;  %v4067_v24 = vld [vmem:[#allocation8 + $0x70] sm:$0xff] }
 0x31d   :  { %3417 = vmatmul.mubr.msk.bf16.gmra.mrb[80].mxu0 %vm444_vm0, %v3899_v23  ;;  %3422 = vmatmul.mubr.msk.bf16.gmra.mrb[88].mxu1 %vm444_vm0, %v3899_v23  ;;  %v4073_v25 = vld [vmem:[#allocation8 + $0xf0] sm:$0xff] }
 0x31e   :  { %2097 = vmatprep.mubr.bf16.mxu0 %v3748_v0  ;;  %2180 = vmatprep.mubr.bf16.mxu1 %v3748_v0  ;;  %v3285_v53 = vcombine.low %v4067_v24, %v4073_v25 }
 0x325   :  { %3418 = vmatmul.mubr.msk.bf16.gmra.mrb[84].mxu0 %vm444_vm0, %v3908_v32  ;;  %3423 = vmatmul.mubr.msk.bf16.gmra.mrb[92].mxu1 %vm444_vm0, %v3908_v32 }
 0x326   :  { %2107 = vmatprep.mubr.bf16.mxu0 %v3748_v0  ;;  %2190 = vmatprep.mubr.bf16.mxu1 %v3748_v0 }
 0x32d   :  { %3419 = vmatmul.mubr.msk.bf16.gmra.mrb[88].mxu0 %vm444_vm0, %v3917_v33  ;;  %3424 = vmatmul.mubr.msk.bf16.gmra.mrb[96].mxu1 %vm444_vm0, %v3917_v33 }
 0x32e   :  { %2233 = vmatprep.mubr.bf16.mxu0 %v3748_v0  ;;  %2316 = vmatprep.mubr.bf16.mxu1 %v3748_v0 }
 0x335   :  { %3425 = vmatmul.mubr.msk.bf16.vlgmr.msra.gmra.mrb[92].mxu0 %vm444_vm0, %v3880_v47  ;;  %3430 = vmatmul.mubr.msk.bf16.vlgmr.msra.gmra.mrb[100].mxu1 %vm444_vm0, %v3880_v47 }
 0x336   :  { %2243 = vmatprep.mubr.bf16.mxu0 %v3748_v0  ;;  %2326 = vmatprep.mubr.bf16.mxu1 %v3748_v0 }
 0x337   :  { %2368 = vmatpush1.bf16.msra.mxu0 %v3277_v30  ;;  %2451 = vmatpush1.bf16.msra.mxu1 %v3279_v31  ;;  %v3286_v30 = vcombine.high %v4067_v24, %v4073_v25  ;;  %v3288_v31 = vcombine.high %v4075_v26, %v4077_v27 }
 0x338   :  { %2369 = vmatprep.subr.bf16.mxu0 %v3310_v34  ;;  %2452 = vmatprep.subr.bf16.mxu1 %v3312_v35 }
 0x33b   :  { %2370 = vmatpush1.bf16.msra.mxu0 %v3309_v40  ;;  %2453 = vmatpush1.bf16.msra.mxu1 %v3311_v41 }
 0x33c   :  { %2371 = vmatprep.subr.bf16.mxu0 %v3342_v42  ;;  %2454 = vmatprep.subr.bf16.mxu1 %v3344_v43  ;;  %v799_v43 = vld [vmem:[#allocation8 + $0x170] sm:$0xff] }
 0x33d   :  { %3426 = vmatmul.mubr.msk.bf16.gmra.mrb[96].mxu0 %vm444_vm0, %v3890_v7  ;;  %3431 = vmatmul.mubr.msk.bf16.gmra.mrb[104].mxu1 %vm444_vm0, %v3890_v7  ;;  %v3318_v55 = vcombine.high %v799_v43, %v815_v46  ;;  %v3317_v62 = vcombine.low %v799_v43, %v815_v46  ;;  %v4135_v46 = vld [vmem:[#allocation2 + $0x20] sm:$0xff] }
 0x33e   :  { %2253 = vmatprep.mubr.bf16.mxu0 %v3748_v0  ;;  %2336 = vmatprep.mubr.bf16.mxu1 %v3748_v0 }
 0x33f   :  { %2372 = vmatpush1.bf16.msra.mxu0 %v3341_v49  ;;  %2455 = vmatpush1.bf16.msra.mxu1 %v3343_v50  ;;  %v816_v49 = vld [vmem:[#allocation8 + $0x1f8] sm:$0xff] }
 0x340   :  { %2373 = vmatprep.subr.bf16.mxu0 %v3374_v51  ;;  %2456 = vmatprep.subr.bf16.mxu1 %v3376_v52  ;;  %v3320_v57 = vcombine.high %v800_v48, %v816_v49  ;;  %v3319_v63 = vcombine.low %v800_v48, %v816_v49 }
 0x343   :  { %2374 = vmatpush1.bf16.msra.mxu0 %v3373_v58  ;;  %2457 = vmatpush1.bf16.msra.mxu1 %v3375_v59  ;;  %v831_v58 = vld [vmem:[#allocation8 + $0x270] sm:$0xff] }
 0x344   :  { %2533 = vmatprep.subr.bf16.mxu0 %v3282_v60  ;;  %2616 = vmatprep.subr.bf16.mxu1 %v3284_v61  ;;  %v847_v59 = vld [vmem:[#allocation8 + $0x2f0] sm:$0xff]  ;;  %v832_v60 = vld [vmem:[#allocation8 + $0x278] sm:$0xff] }
 0x345   :  { %3427 = vmatmul.mubr.msk.bf16.gmra.mrb[100].mxu0 %vm444_vm0, %v3899_v23  ;;  %3432 = vmatmul.mubr.msk.bf16.gmra.mrb[108].mxu1 %vm444_vm0, %v3899_v23  ;;  %v848_v61 = vld [vmem:[#allocation8 + $0x2f8] sm:$0xff] }
 0x346   :  { %2263 = vmatprep.mubr.bf16.mxu0 %v3748_v0  ;;  %2346 = vmatprep.mubr.bf16.mxu1 %v3748_v0  ;;  %v3351_v15 = vcombine.low %v832_v60, %v848_v61 }
 0x34d   :  { %3428 = vmatmul.mubr.msk.bf16.gmra.mrb[104].mxu0 %vm444_vm0, %v3908_v32  ;;  %3433 = vmatmul.mubr.msk.bf16.gmra.mrb[112].mxu1 %vm444_vm0, %v3908_v32 }
 0x34e   :  { %2273 = vmatprep.mubr.bf16.mxu0 %v3748_v0  ;;  %2356 = vmatprep.mubr.bf16.mxu1 %v3748_v0 }
 0x355   :  { %3429 = vmatmul.mubr.msk.bf16.gmra.mrb[108].mxu0 %vm444_vm0, %v3917_v33  ;;  %3434 = vmatmul.mubr.msk.bf16.gmra.mrb[116].mxu1 %vm444_vm0, %v3917_v33 }
 0x356   :  { %2399 = vmatprep.mubr.bf16.mxu0 %v3748_v0  ;;  %2482 = vmatprep.mubr.bf16.mxu1 %v3748_v0 }
 0x35d   :  { %3435 = vmatmul.mubr.msk.bf16.vlgmr.msra.gmra.mrb[112].mxu0 %vm444_vm0, %v3880_v47  ;;  %3440 = vmatmul.mubr.msk.bf16.vlgmr.msra.gmra.mrb[120].mxu1 %vm444_vm0, %v3880_v47 }
 0x35e   :  { %2409 = vmatprep.mubr.bf16.mxu0 %v3748_v0  ;;  %2492 = vmatprep.mubr.bf16.mxu1 %v3748_v0 }
 0x35f   :  { %2534 = vmatpush1.bf16.msra.mxu0 %v3281_v2  ;;  %2617 = vmatpush1.bf16.msra.mxu1 %v3283_v3  ;;  %v3350_v2 = vcombine.high %v831_v58, %v847_v59  ;;  %v3352_v3 = vcombine.high %v832_v60, %v848_v61 }
 0x360   :  { %2535 = vmatprep.subr.bf16.mxu0 %v3314_v4  ;;  %2618 = vmatprep.subr.bf16.mxu1 %v3316_v5  ;;  %v863_v4 = vld [vmem:[#allocation8 + $0x370] sm:$0xff] }
 0x361   :  { %v3382_v16 = vcombine.high %v863_v4, %v879_v6 }
 0x363   :  { %2536 = vmatpush1.bf16.msra.mxu0 %v3313_v11  ;;  %2619 = vmatpush1.bf16.msra.mxu1 %v3315_v12 }
 0x364   :  { %2537 = vmatprep.subr.bf16.mxu0 %v3346_v13  ;;  %2620 = vmatprep.subr.bf16.mxu1 %v3348_v14  ;;  %v3349_v14 = vcombine.low %v831_v58, %v847_v59 }
 0x365   :  { %3436 = vmatmul.mubr.msk.bf16.gmra.mrb[116].mxu0 %vm444_vm0, %v3890_v7  ;;  %3441 = vmatmul.mubr.msk.bf16.gmra.mrb[124].mxu1 %vm444_vm0, %v3890_v7 }
 0x366   :  { %2419 = vmatprep.mubr.bf16.mxu0 %v3748_v0  ;;  %2502 = vmatprep.mubr.bf16.mxu1 %v3748_v0 }
 0x367   :  { %2538 = vmatpush1.bf16.msra.mxu0 %v3345_v19  ;;  %2621 = vmatpush1.bf16.msra.mxu1 %v3347_v20  ;;  %v3381_v19 = vcombine.low %v863_v4, %v879_v6  ;;  %v3383_v20 = vcombine.low %v864_v8, %v880_v9  ;;  %v3644_v9 = vld [vmem:[#allocation2 + $0x10] sm:$0xff] }
 0x368   :  { %2539 = vmatprep.subr.bf16.mxu0 %v3378_v21  ;;  %2622 = vmatprep.subr.bf16.mxu1 %v3380_v22 }
 0x36b   :  { %2540 = vmatpush1.bf16.msra.mxu0 %v3377_v28  ;;  %2623 = vmatpush1.bf16.msra.mxu1 %v3379_v29 }
 0x36c   :  { %2699 = vmatprep.subr.bf16.mxu0 %v3286_v30  ;;  %2782 = vmatprep.subr.bf16.mxu1 %v3288_v31 }
 0x36d   :  { %3437 = vmatmul.mubr.msk.bf16.gmra.mrb[120].mxu0 %vm444_vm0, %v3899_v23  ;;  %3442 = vmatmul.mubr.msk.bf16.gmra.mrb[128].mxu1 %vm444_vm0, %v3899_v23 }
 0x36e   :  { %2429 = vmatprep.mubr.bf16.mxu0 %v3748_v0  ;;  %2512 = vmatprep.mubr.bf16.mxu1 %v3748_v0 }
 0x374   :  { %v1591_v34 = vpop.f32.mrb[20].mxu0  ;;  %v1674_v35 = vpop.f32.mrb[28].mxu1 }
 0x375   :  { %2993 = vst [vmem:[#allocation9 + $0x400] sm:$0xff] %v1591_v34  ;;  %2995 = vst [vmem:[#allocation9 + $0x410] sm:$0xff] %v1674_v35  ;;  %v1593_v36 = vpop.f32.mrb[21].mxu0  ;;  %v1676_v37 = vpop.f32.mrb[29].mxu1  ;;  %3438 = vmatmul.mubr.msk.bf16.gmra.mrb[124].mxu0 %vm444_vm0, %v3908_v32  ;;  %3443 = vmatmul.mubr.msk.bf16.gmra.mrb[132].mxu1 %vm444_vm0, %v3908_v32 }
 0x376   :  { %2994 = vst [vmem:[#allocation9 + $0x408] sm:$0xff] %v1593_v36  ;;  %2996 = vst [vmem:[#allocation9 + $0x418] sm:$0xff] %v1676_v37  ;;  %v1595_v38 = vpop.f32.mrb[22].mxu0  ;;  %v1678_v39 = vpop.f32.mrb[30].mxu1  ;;  %2439 = vmatprep.mubr.bf16.mxu0 %v3748_v0  ;;  %2522 = vmatprep.mubr.bf16.mxu1 %v3748_v0 }
 0x377   :  { %3025 = vst [vmem:[#allocation9 + $0x500] sm:$0xff] %v1595_v38  ;;  %3027 = vst [vmem:[#allocation9 + $0x510] sm:$0xff] %v1678_v39  ;;  %v1597_v40 = vpop.f32.mrb[23].mxu0  ;;  %v1680_v41 = vpop.f32.mrb[31].mxu1 }
 0x378   :  { %3026 = vst [vmem:[#allocation9 + $0x508] sm:$0xff] %v1597_v40  ;;  %3028 = vst [vmem:[#allocation9 + $0x518] sm:$0xff] %v1680_v41 }
 0x37d   :  { %3439 = vmatmul.mubr.msk.bf16.gmra.mrb[128].mxu0 %vm444_vm0, %v3917_v33  ;;  %3444 = vmatmul.mubr.msk.bf16.gmra.mrb[136].mxu1 %vm444_vm0, %v3917_v33 }
 0x37e   :  { %2565 = vmatprep.mubr.bf16.mxu0 %v3748_v0  ;;  %2648 = vmatprep.mubr.bf16.mxu1 %v3748_v0 }
 0x380   :  { %v1601_v32 = vpop.f32.mrb[24].mxu0  ;;  %v1684_v42 = vpop.f32.mrb[32].mxu1 }
 0x381   :  { %3057 = vst [vmem:[#allocation9 + $0x600] sm:$0xff] %v1601_v32  ;;  %3059 = vst [vmem:[#allocation9 + $0x610] sm:$0xff] %v1684_v42  ;;  %v1603_v44 = vpop.f32.mrb[25].mxu0  ;;  %v1686_v45 = vpop.f32.mrb[33].mxu1 }
 0x382   :  { %3058 = vst [vmem:[#allocation9 + $0x608] sm:$0xff] %v1603_v44  ;;  %3060 = vst [vmem:[#allocation9 + $0x618] sm:$0xff] %v1686_v45  ;;  %v1605_v50 = vpop.f32.mrb[26].mxu0  ;;  %v1688_v51 = vpop.f32.mrb[34].mxu1 }
 0x383   :  { %3089 = vst [vmem:[#allocation9 + $0x700] sm:$0xff] %v1605_v50  ;;  %3091 = vst [vmem:[#allocation9 + $0x710] sm:$0xff] %v1688_v51  ;;  %v1607_v33 = vpop.f32.mrb[27].mxu0  ;;  %v1690_v52 = vpop.f32.mrb[35].mxu1 }
 0x384   :  { %3090 = vst [vmem:[#allocation9 + $0x708] sm:$0xff] %v1607_v33  ;;  %3092 = vst [vmem:[#allocation9 + $0x718] sm:$0xff] %v1690_v52 }
 0x385   :  { %3445 = vmatmul.mubr.msk.bf16.vlgmr.msra.gmra.mrb[132].mxu0 %vm444_vm0, %v3880_v47  ;;  %3450 = vmatmul.mubr.msk.bf16.vlgmr.msra.gmra.mrb[140].mxu1 %vm444_vm0, %v3880_v47 }
 0x386   :  { %2575 = vmatprep.mubr.bf16.mxu0 %v3748_v0  ;;  %2658 = vmatprep.mubr.bf16.mxu1 %v3748_v0 }
 0x387   :  { %2700 = vmatpush1.bf16.msra.mxu0 %v3285_v53  ;;  %2783 = vmatpush1.bf16.msra.mxu1 %v3287_v54 }
 0x388   :  { %v1611_v1 = vpop.f32.mrb[28].mxu0  ;;  %v1694_v56 = vpop.f32.mrb[36].mxu1  ;;  %2701 = vmatprep.subr.bf16.mxu0 %v3318_v55  ;;  %2784 = vmatprep.subr.bf16.mxu1 %v3320_v57  ;;  %v3643_v55 = vld [vmem:[#allocation2] sm:$0xff] }
 0x389   :  { %3121 = vst [vmem:[#allocation9 + $0x800] sm:$0xff] %v1611_v1  ;;  %3123 = vst [vmem:[#allocation9 + $0x810] sm:$0xff] %v1694_v56  ;;  %v1613_v47 = vpop.f32.mrb[29].mxu0  ;;  %v1696_v5 = vpop.f32.mrb[37].mxu1 }
 0x38a   :  { %3122 = vst [vmem:[#allocation9 + $0x808] sm:$0xff] %v1613_v47  ;;  %3124 = vst [vmem:[#allocation9 + $0x818] sm:$0xff] %v1696_v5  ;;  %v1615_v10 = vpop.f32.mrb[30].mxu0  ;;  %v1698_v11 = vpop.f32.mrb[38].mxu1 }
 0x38b   :  { %3153 = vst [vmem:[#allocation9 + $0x900] sm:$0xff] %v1615_v10  ;;  %3155 = vst [vmem:[#allocation9 + $0x910] sm:$0xff] %v1698_v11  ;;  %v1617_v12 = vpop.f32.mrb[31].mxu0  ;;  %v1700_v13 = vpop.f32.mrb[39].mxu1  ;;  %2702 = vmatpush1.bf16.msra.mxu0 %v3317_v62  ;;  %2785 = vmatpush1.bf16.msra.mxu1 %v3319_v63 }
 0x38c   :  { %3154 = vst [vmem:[#allocation9 + $0x908] sm:$0xff] %v1617_v12  ;;  %3156 = vst [vmem:[#allocation9 + $0x918] sm:$0xff] %v1700_v13  ;;  %2703 = vmatprep.subr.bf16.mxu0 %v3350_v2  ;;  %2786 = vmatprep.subr.bf16.mxu1 %v3352_v3 }
 0x38d   :  { %3446 = vmatmul.mubr.msk.bf16.gmra.mrb[136].mxu0 %vm444_vm0, %v3890_v7  ;;  %3451 = vmatmul.mubr.msk.bf16.gmra.mrb[144].mxu1 %vm444_vm0, %v4115_v18 }
 0x38e   :  { %2585 = vmatprep.mubr.bf16.mxu0 %v3748_v0  ;;  %2668 = vmatprep.mubr.bf16.mxu1 %v3748_v0 }
 0x38f   :  { %2704 = vmatpush1.bf16.msra.mxu0 %v3349_v14  ;;  %2787 = vmatpush1.bf16.msra.mxu1 %v3351_v15 }
 0x390   :  { %v1737_v21 = vpop.f32.mrb[32].mxu0  ;;  %v1820_v22 = vpop.f32.mrb[40].mxu1  ;;  %2705 = vmatprep.subr.bf16.mxu0 %v3382_v16  ;;  %2788 = vmatprep.subr.bf16.mxu1 %v3384_v17 }
 0x391   :  { %2869 = vst [vmem:[#allocation9 + $0x20] sm:$0xff] %v1737_v21  ;;  %2871 = vst [vmem:[#allocation9 + $0x30] sm:$0xff] %v1820_v22  ;;  %v1739_v7 = vpop.f32.mrb[33].mxu0  ;;  %v1822_v24 = vpop.f32.mrb[41].mxu1 }
 0x392   :  { %2870 = vst [vmem:[#allocation9 + $0x28] sm:$0xff] %v1739_v7  ;;  %2872 = vst [vmem:[#allocation9 + $0x38] sm:$0xff] %v1822_v24  ;;  %v1741_v25 = vpop.f32.mrb[34].mxu0  ;;  %v1824_v26 = vpop.f32.mrb[42].mxu1 }
 0x393   :  { %2901 = vst [vmem:[#allocation9 + $0x120] sm:$0xff] %v1741_v25  ;;  %2903 = vst [vmem:[#allocation9 + $0x130] sm:$0xff] %v1824_v26  ;;  %v1743_v27 = vpop.f32.mrb[35].mxu0  ;;  %v1826_v28 = vpop.f32.mrb[43].mxu1  ;;  %2706 = vmatpush1.bf16.msra.mxu0 %v3381_v19  ;;  %2789 = vmatpush1.bf16.msra.mxu1 %v3383_v20 }
 0x394   :  { %2902 = vst [vmem:[#allocation9 + $0x128] sm:$0xff] %v1743_v27  ;;  %2904 = vst [vmem:[#allocation9 + $0x138] sm:$0xff] %v1826_v28 }
 0x395   :  { %3447 = vmatmul.mubr.msk.bf16.gmra.mrb[140].mxu0 %vm444_vm0, %v3899_v23  ;;  %3452 = vmatmul.mubr.msk.bf16.gmra.mrb[148].mxu1 %vm444_vm0, %v3899_v23  ;;  %v4127_v23 = vld [vmem:[#allocation2 + $0x18] sm:$0xff] }
 0x396   :  { %2595 = vmatprep.mubr.bf16.mxu0 %v3748_v0  ;;  %2678 = vmatprep.mubr.bf16.mxu1 %v3748_v0 }
 0x398   :  { %v1747_v29 = vpop.f32.mrb[36].mxu0  ;;  %v1830_v30 = vpop.f32.mrb[44].mxu1 }
 0x399   :  { %2933 = vst [vmem:[#allocation9 + $0x220] sm:$0xff] %v1747_v29  ;;  %2935 = vst [vmem:[#allocation9 + $0x230] sm:$0xff] %v1830_v30  ;;  %v1749_v31 = vpop.f32.mrb[37].mxu0  ;;  %v1832_v34 = vpop.f32.mrb[45].mxu1 }
 0x39a   :  { %2934 = vst [vmem:[#allocation9 + $0x228] sm:$0xff] %v1749_v31  ;;  %2936 = vst [vmem:[#allocation9 + $0x238] sm:$0xff] %v1832_v34  ;;  %v1751_v35 = vpop.f32.mrb[38].mxu0  ;;  %v1834_v36 = vpop.f32.mrb[46].mxu1 }
 0x39b   :  { %2965 = vst [vmem:[#allocation9 + $0x320] sm:$0xff] %v1751_v35  ;;  %2967 = vst [vmem:[#allocation9 + $0x330] sm:$0xff] %v1834_v36  ;;  %v1753_v37 = vpop.f32.mrb[39].mxu0  ;;  %v1836_v38 = vpop.f32.mrb[47].mxu1 }
 0x39c   :  { %2966 = vst [vmem:[#allocation9 + $0x328] sm:$0xff] %v1753_v37  ;;  %2968 = vst [vmem:[#allocation9 + $0x338] sm:$0xff] %v1836_v38 }
 0x39d   :  { %3448 = vmatmul.mubr.msk.bf16.gmra.mrb[144].mxu0 %vm444_vm0, %v4127_v23  ;;  %3453 = vmatmul.mubr.msk.bf16.gmra.mrb[152].mxu1 %vm444_vm0, %v4127_v23 }
 0x39e   :  { %2605 = vmatprep.mubr.bf16.mxu0 %v3748_v0  ;;  %2688 = vmatprep.mubr.bf16.mxu1 %v3748_v0 }
 0x3a0   :  { %v1757_v39 = vpop.f32.mrb[40].mxu0  ;;  %v1840_v40 = vpop.f32.mrb[48].mxu1 }
 0x3a1   :  { %2997 = vst [vmem:[#allocation9 + $0x420] sm:$0xff] %v1757_v39  ;;  %2999 = vst [vmem:[#allocation9 + $0x430] sm:$0xff] %v1840_v40  ;;  %v1759_v41 = vpop.f32.mrb[41].mxu0  ;;  %v1842_v32 = vpop.f32.mrb[49].mxu1 }
 0x3a2   :  { %2998 = vst [vmem:[#allocation9 + $0x428] sm:$0xff] %v1759_v41  ;;  %3000 = vst [vmem:[#allocation9 + $0x438] sm:$0xff] %v1842_v32  ;;  %v1761_v42 = vpop.f32.mrb[42].mxu0  ;;  %v1844_v43 = vpop.f32.mrb[50].mxu1 }
 0x3a3   :  { %3029 = vst [vmem:[#allocation9 + $0x520] sm:$0xff] %v1761_v42  ;;  %3031 = vst [vmem:[#allocation9 + $0x530] sm:$0xff] %v1844_v43  ;;  %v1763_v44 = vpop.f32.mrb[43].mxu0  ;;  %v1846_v45 = vpop.f32.mrb[51].mxu1 }
 0x3a4   :  { %3030 = vst [vmem:[#allocation9 + $0x528] sm:$0xff] %v1763_v44  ;;  %3032 = vst [vmem:[#allocation9 + $0x538] sm:$0xff] %v1846_v45 }
 0x3a5   :  { %3449 = vmatmul.mubr.msk.bf16.gmra.mrb[148].mxu0 %vm444_vm0, %v4135_v46  ;;  %3454 = vmatmul.mubr.msk.bf16.gmra.mrb[156].mxu1 %vm444_vm0, %v4135_v46 }
 0x3a6   :  { %2731 = vmatprep.mubr.bf16.mxu0 %v3748_v0  ;;  %2814 = vmatprep.mubr.bf16.mxu1 %v3748_v0 }
 0x3a8   :  { %v1767_v48 = vpop.f32.mrb[44].mxu0  ;;  %v1850_v49 = vpop.f32.mrb[52].mxu1 }
 0x3a9   :  { %3061 = vst [vmem:[#allocation9 + $0x620] sm:$0xff] %v1767_v48  ;;  %3063 = vst [vmem:[#allocation9 + $0x630] sm:$0xff] %v1850_v49  ;;  %v1769_v50 = vpop.f32.mrb[45].mxu0  ;;  %v1852_v51 = vpop.f32.mrb[53].mxu1 }
 0x3aa   :  { %3062 = vst [vmem:[#allocation9 + $0x628] sm:$0xff] %v1769_v50  ;;  %3064 = vst [vmem:[#allocation9 + $0x638] sm:$0xff] %v1852_v51  ;;  %v1771_v33 = vpop.f32.mrb[46].mxu0  ;;  %v1854_v52 = vpop.f32.mrb[54].mxu1 }
 0x3ab   :  { %3093 = vst [vmem:[#allocation9 + $0x720] sm:$0xff] %v1771_v33  ;;  %3095 = vst [vmem:[#allocation9 + $0x730] sm:$0xff] %v1854_v52  ;;  %v1773_v53 = vpop.f32.mrb[47].mxu0  ;;  %v1856_v54 = vpop.f32.mrb[55].mxu1 }
 0x3ac   :  { %3094 = vst [vmem:[#allocation9 + $0x728] sm:$0xff] %v1773_v53  ;;  %3096 = vst [vmem:[#allocation9 + $0x738] sm:$0xff] %v1856_v54 }
 0x3ad   :  { %3455 = vmatmul.mubr.msk.bf16.vlgmr.msra.gmra.mrb[152].mxu0 %vm444_vm0, %v3643_v55  ;;  %3460 = vmatmul.mubr.msk.bf16.vlgmr.msra.gmra.mrb[160].mxu1 %vm444_vm0, %v3643_v55 }
 0x3ae   :  { %2741 = vmatprep.mubr.bf16.mxu0 %v3748_v0  ;;  %2824 = vmatprep.mubr.bf16.mxu1 %v3748_v0 }
 0x3b0   :  { %v1777_v57 = vpop.f32.mrb[48].mxu0  ;;  %v1860_v58 = vpop.f32.mrb[56].mxu1 }
 0x3b1   :  { %3125 = vst [vmem:[#allocation9 + $0x820] sm:$0xff] %v1777_v57  ;;  %3127 = vst [vmem:[#allocation9 + $0x830] sm:$0xff] %v1860_v58  ;;  %v1779_v59 = vpop.f32.mrb[49].mxu0  ;;  %v1862_v60 = vpop.f32.mrb[57].mxu1 }
 0x3b2   :  { %3126 = vst [vmem:[#allocation9 + $0x828] sm:$0xff] %v1779_v59  ;;  %3128 = vst [vmem:[#allocation9 + $0x838] sm:$0xff] %v1862_v60  ;;  %v1781_v61 = vpop.f32.mrb[50].mxu0  ;;  %v1864_v62 = vpop.f32.mrb[58].mxu1 }
 0x3b3   :  { %3157 = vst [vmem:[#allocation9 + $0x920] sm:$0xff] %v1781_v61  ;;  %3159 = vst [vmem:[#allocation9 + $0x930] sm:$0xff] %v1864_v62  ;;  %v1783_v63 = vpop.f32.mrb[51].mxu0  ;;  %v1866_v1 = vpop.f32.mrb[59].mxu1 }
 0x3b4   :  { %3158 = vst [vmem:[#allocation9 + $0x928] sm:$0xff] %v1783_v63  ;;  %3160 = vst [vmem:[#allocation9 + $0x938] sm:$0xff] %v1866_v1 }
 0x3b5   :  { %3456 = vmatmul.mubr.msk.bf16.gmra.mrb[156].mxu0 %vm444_vm0, %v4115_v18  ;;  %3461 = vmatmul.mubr.msk.bf16.gmra.mrb[164].mxu1 %vm444_vm0, %v4115_v18 }
 0x3b6   :  { %2751 = vmatprep.mubr.bf16.mxu0 %v3748_v0  ;;  %2834 = vmatprep.mubr.bf16.mxu1 %v3748_v0 }
 0x3b8   :  { %v1903_v56 = vpop.f32.mrb[52].mxu0  ;;  %v1986_v2 = vpop.f32.mrb[60].mxu1 }
 0x3b9   :  { %2873 = vst [vmem:[#allocation9 + $0x40] sm:$0xff] %v1903_v56  ;;  %2875 = vst [vmem:[#allocation9 + $0x50] sm:$0xff] %v1986_v2  ;;  %v1905_v3 = vpop.f32.mrb[53].mxu0  ;;  %v1988_v4 = vpop.f32.mrb[61].mxu1 }
 0x3ba   :  { %2874 = vst [vmem:[#allocation9 + $0x48] sm:$0xff] %v1905_v3  ;;  %2876 = vst [vmem:[#allocation9 + $0x58] sm:$0xff] %v1988_v4  ;;  %v1907_v47 = vpop.f32.mrb[54].mxu0  ;;  %v1990_v5 = vpop.f32.mrb[62].mxu1 }
 0x3bb   :  { %2905 = vst [vmem:[#allocation9 + $0x140] sm:$0xff] %v1907_v47  ;;  %2907 = vst [vmem:[#allocation9 + $0x150] sm:$0xff] %v1990_v5  ;;  %v1909_v6 = vpop.f32.mrb[55].mxu0  ;;  %v1992_v8 = vpop.f32.mrb[63].mxu1 }
 0x3bc   :  { %2906 = vst [vmem:[#allocation9 + $0x148] sm:$0xff] %v1909_v6  ;;  %2908 = vst [vmem:[#allocation9 + $0x158] sm:$0xff] %v1992_v8 }
 0x3bd   :  { %3457 = vmatmul.mubr.msk.bf16.gmra.mrb[160].mxu0 %vm444_vm0, %v3644_v9  ;;  %3462 = vmatmul.mubr.msk.bf16.gmra.mrb[168].mxu1 %vm444_vm0, %v3644_v9 }
 0x3be   :  { %2761 = vmatprep.mubr.bf16.mxu0 %v3748_v0  ;;  %2844 = vmatprep.mubr.bf16.mxu1 %v3748_v0 }
 0x3c0   :  { %v1913_v10 = vpop.f32.mrb[56].mxu0  ;;  %v1996_v11 = vpop.f32.mrb[64].mxu1 }
 0x3c1   :  { %2937 = vst [vmem:[#allocation9 + $0x240] sm:$0xff] %v1913_v10  ;;  %2939 = vst [vmem:[#allocation9 + $0x250] sm:$0xff] %v1996_v11  ;;  %v1915_v12 = vpop.f32.mrb[57].mxu0  ;;  %v1998_v13 = vpop.f32.mrb[65].mxu1 }
 0x3c2   :  { %2938 = vst [vmem:[#allocation9 + $0x248] sm:$0xff] %v1915_v12  ;;  %2940 = vst [vmem:[#allocation9 + $0x258] sm:$0xff] %v1998_v13  ;;  %v1917_v14 = vpop.f32.mrb[58].mxu0  ;;  %v2000_v15 = vpop.f32.mrb[66].mxu1 }
 0x3c3   :  { %2969 = vst [vmem:[#allocation9 + $0x340] sm:$0xff] %v1917_v14  ;;  %2971 = vst [vmem:[#allocation9 + $0x350] sm:$0xff] %v2000_v15  ;;  %v1919_v16 = vpop.f32.mrb[59].mxu0  ;;  %v2002_v17 = vpop.f32.mrb[67].mxu1 }
 0x3c4   :  { %2970 = vst [vmem:[#allocation9 + $0x348] sm:$0xff] %v1919_v16  ;;  %2972 = vst [vmem:[#allocation9 + $0x358] sm:$0xff] %v2002_v17 }
 0x3c5   :  { %3458 = vmatmul.mubr.msk.bf16.gmra.mrb[164].mxu0 %vm444_vm0, %v4127_v23  ;;  %3463 = vmatmul.mubr.msk.bf16.gmra.mrb[172].mxu1 %vm444_vm0, %v4127_v23 }
 0x3c6   :  { %2771 = vmatprep.mubr.bf16.mxu0 %v3748_v0  ;;  %2854 = vmatprep.mubr.bf16.mxu1 %v3748_v0 }
 0x3c8   :  { %v1923_v18 = vpop.f32.mrb[60].mxu0  ;;  %v2006_v19 = vpop.f32.mrb[68].mxu1 }
 0x3c9   :  { %3001 = vst [vmem:[#allocation9 + $0x440] sm:$0xff] %v1923_v18  ;;  %3003 = vst [vmem:[#allocation9 + $0x450] sm:$0xff] %v2006_v19  ;;  %v1925_v20 = vpop.f32.mrb[61].mxu0  ;;  %v2008_v21 = vpop.f32.mrb[69].mxu1 }
 0x3ca   :  { %3002 = vst [vmem:[#allocation9 + $0x448] sm:$0xff] %v1925_v20  ;;  %3004 = vst [vmem:[#allocation9 + $0x458] sm:$0xff] %v2008_v21  ;;  %v1927_v22 = vpop.f32.mrb[62].mxu0  ;;  %v2010_v7 = vpop.f32.mrb[70].mxu1 }
 0x3cb   :  { %3033 = vst [vmem:[#allocation9 + $0x540] sm:$0xff] %v1927_v22  ;;  %3035 = vst [vmem:[#allocation9 + $0x550] sm:$0xff] %v2010_v7  ;;  %v1929_v24 = vpop.f32.mrb[63].mxu0  ;;  %v2012_v25 = vpop.f32.mrb[71].mxu1 }
 0x3cc   :  { %3034 = vst [vmem:[#allocation9 + $0x548] sm:$0xff] %v1929_v24  ;;  %3036 = vst [vmem:[#allocation9 + $0x558] sm:$0xff] %v2012_v25 }
 0x3cd   :  { %3459 = vmatmul.mubr.msk.bf16.gmra.mrb[168].mxu0 %vm444_vm0, %v4135_v46  ;;  %3464 = vmatmul.mubr.msk.bf16.gmra.mrb[176].mxu1 %vm444_vm0, %v4135_v46 }
 0x3d0   :  { %v1933_v0 = vpop.f32.mrb[64].mxu0  ;;  %v2016_v26 = vpop.f32.mrb[72].mxu1 }
 0x3d1   :  { %3065 = vst [vmem:[#allocation9 + $0x640] sm:$0xff] %v1933_v0  ;;  %3067 = vst [vmem:[#allocation9 + $0x650] sm:$0xff] %v2016_v26  ;;  %v1935_v27 = vpop.f32.mrb[65].mxu0  ;;  %v2018_v28 = vpop.f32.mrb[73].mxu1 }
 0x3d2   :  { %3066 = vst [vmem:[#allocation9 + $0x648] sm:$0xff] %v1935_v27  ;;  %3068 = vst [vmem:[#allocation9 + $0x658] sm:$0xff] %v2018_v28  ;;  %v1937_v29 = vpop.f32.mrb[66].mxu0  ;;  %v2020_v30 = vpop.f32.mrb[74].mxu1 }
 0x3d3   :  { %3097 = vst [vmem:[#allocation9 + $0x740] sm:$0xff] %v1937_v29  ;;  %3099 = vst [vmem:[#allocation9 + $0x750] sm:$0xff] %v2020_v30  ;;  %v1939_v31 = vpop.f32.mrb[67].mxu0  ;;  %v2022_v34 = vpop.f32.mrb[75].mxu1 }
 0x3d4   :  { %3098 = vst [vmem:[#allocation9 + $0x748] sm:$0xff] %v1939_v31  ;;  %3100 = vst [vmem:[#allocation9 + $0x758] sm:$0xff] %v2022_v34 }
 0x3d8   :  { %v1943_v35 = vpop.f32.mrb[68].mxu0  ;;  %v2026_v36 = vpop.f32.mrb[76].mxu1 }
 0x3d9   :  { %3129 = vst [vmem:[#allocation9 + $0x840] sm:$0xff] %v1943_v35  ;;  %3131 = vst [vmem:[#allocation9 + $0x850] sm:$0xff] %v2026_v36  ;;  %v1945_v37 = vpop.f32.mrb[69].mxu0  ;;  %v2028_v38 = vpop.f32.mrb[77].mxu1 }
 0x3da   :  { %3130 = vst [vmem:[#allocation9 + $0x848] sm:$0xff] %v1945_v37  ;;  %3132 = vst [vmem:[#allocation9 + $0x858] sm:$0xff] %v2028_v38  ;;  %v1947_v23 = vpop.f32.mrb[70].mxu0  ;;  %v2030_v39 = vpop.f32.mrb[78].mxu1 }
 0x3db   :  { %3161 = vst [vmem:[#allocation9 + $0x940] sm:$0xff] %v1947_v23  ;;  %3163 = vst [vmem:[#allocation9 + $0x950] sm:$0xff] %v2030_v39  ;;  %v1949_v40 = vpop.f32.mrb[71].mxu0  ;;  %v2032_v41 = vpop.f32.mrb[79].mxu1 }
 0x3dc   :  { %3162 = vst [vmem:[#allocation9 + $0x948] sm:$0xff] %v1949_v40  ;;  %3164 = vst [vmem:[#allocation9 + $0x958] sm:$0xff] %v2032_v41 }
 0x3e0   :  { %v2069_v32 = vpop.f32.mrb[72].mxu0  ;;  %v2152_v42 = vpop.f32.mrb[80].mxu1 }
 0x3e1   :  { %2877 = vst [vmem:[#allocation9 + $0x60] sm:$0xff] %v2069_v32  ;;  %2879 = vst [vmem:[#allocation9 + $0x70] sm:$0xff] %v2152_v42  ;;  %v2071_v43 = vpop.f32.mrb[73].mxu0  ;;  %v2154_v44 = vpop.f32.mrb[81].mxu1 }
 0x3e2   :  { %2878 = vst [vmem:[#allocation9 + $0x68] sm:$0xff] %v2071_v43  ;;  %2880 = vst [vmem:[#allocation9 + $0x78] sm:$0xff] %v2154_v44  ;;  %v2073_v45 = vpop.f32.mrb[74].mxu0  ;;  %v2156_v46 = vpop.f32.mrb[82].mxu1 }
 0x3e3   :  { %2909 = vst [vmem:[#allocation9 + $0x160] sm:$0xff] %v2073_v45  ;;  %2911 = vst [vmem:[#allocation9 + $0x170] sm:$0xff] %v2156_v46  ;;  %v2075_v48 = vpop.f32.mrb[75].mxu0  ;;  %v2158_v49 = vpop.f32.mrb[83].mxu1 }
 0x3e4   :  { %2910 = vst [vmem:[#allocation9 + $0x168] sm:$0xff] %v2075_v48  ;;  %2912 = vst [vmem:[#allocation9 + $0x178] sm:$0xff] %v2158_v49 }
 0x3e8   :  { %v2079_v50 = vpop.f32.mrb[76].mxu0  ;;  %v2162_v51 = vpop.f32.mrb[84].mxu1 }
 0x3e9   :  { %2941 = vst [vmem:[#allocation9 + $0x260] sm:$0xff] %v2079_v50  ;;  %2943 = vst [vmem:[#allocation9 + $0x270] sm:$0xff] %v2162_v51  ;;  %v2081_v33 = vpop.f32.mrb[77].mxu0  ;;  %v2164_v52 = vpop.f32.mrb[85].mxu1 }
 0x3ea   :  { %2942 = vst [vmem:[#allocation9 + $0x268] sm:$0xff] %v2081_v33  ;;  %2944 = vst [vmem:[#allocation9 + $0x278] sm:$0xff] %v2164_v52  ;;  %v2083_v53 = vpop.f32.mrb[78].mxu0  ;;  %v2166_v54 = vpop.f32.mrb[86].mxu1 }
 0x3eb   :  { %2973 = vst [vmem:[#allocation9 + $0x360] sm:$0xff] %v2083_v53  ;;  %2975 = vst [vmem:[#allocation9 + $0x370] sm:$0xff] %v2166_v54  ;;  %v2085_v55 = vpop.f32.mrb[79].mxu0  ;;  %v2168_v57 = vpop.f32.mrb[87].mxu1 }
 0x3ec   :  { %2974 = vst [vmem:[#allocation9 + $0x368] sm:$0xff] %v2085_v55  ;;  %2976 = vst [vmem:[#allocation9 + $0x378] sm:$0xff] %v2168_v57 }
 0x3f0   :  { %v2089_v58 = vpop.f32.mrb[80].mxu0  ;;  %v2172_v59 = vpop.f32.mrb[88].mxu1 }
 0x3f1   :  { %3005 = vst [vmem:[#allocation9 + $0x460] sm:$0xff] %v2089_v58  ;;  %3007 = vst [vmem:[#allocation9 + $0x470] sm:$0xff] %v2172_v59  ;;  %v2091_v60 = vpop.f32.mrb[81].mxu0  ;;  %v2174_v61 = vpop.f32.mrb[89].mxu1 }
 0x3f2   :  { %3006 = vst [vmem:[#allocation9 + $0x468] sm:$0xff] %v2091_v60  ;;  %3008 = vst [vmem:[#allocation9 + $0x478] sm:$0xff] %v2174_v61  ;;  %v2093_v62 = vpop.f32.mrb[82].mxu0  ;;  %v2176_v63 = vpop.f32.mrb[90].mxu1 }
 0x3f3   :  { %3037 = vst [vmem:[#allocation9 + $0x560] sm:$0xff] %v2093_v62  ;;  %3039 = vst [vmem:[#allocation9 + $0x570] sm:$0xff] %v2176_v63  ;;  %v2095_v1 = vpop.f32.mrb[83].mxu0  ;;  %v2178_v56 = vpop.f32.mrb[91].mxu1 }
 0x3f4   :  { %3038 = vst [vmem:[#allocation9 + $0x568] sm:$0xff] %v2095_v1  ;;  %3040 = vst [vmem:[#allocation9 + $0x578] sm:$0xff] %v2178_v56 }
 0x3f8   :  { %v2099_v2 = vpop.f32.mrb[84].mxu0  ;;  %v2182_v3 = vpop.f32.mrb[92].mxu1 }
 0x3f9   :  { %3069 = vst [vmem:[#allocation9 + $0x660] sm:$0xff] %v2099_v2  ;;  %3071 = vst [vmem:[#allocation9 + $0x670] sm:$0xff] %v2182_v3  ;;  %v2101_v4 = vpop.f32.mrb[85].mxu0  ;;  %v2184_v47 = vpop.f32.mrb[93].mxu1 }
 0x3fa   :  { %3070 = vst [vmem:[#allocation9 + $0x668] sm:$0xff] %v2101_v4  ;;  %3072 = vst [vmem:[#allocation9 + $0x678] sm:$0xff] %v2184_v47  ;;  %v2103_v5 = vpop.f32.mrb[86].mxu0  ;;  %v2186_v6 = vpop.f32.mrb[94].mxu1 }
 0x3fb   :  { %3101 = vst [vmem:[#allocation9 + $0x760] sm:$0xff] %v2103_v5  ;;  %3103 = vst [vmem:[#allocation9 + $0x770] sm:$0xff] %v2186_v6  ;;  %v2105_v8 = vpop.f32.mrb[87].mxu0  ;;  %v2188_v9 = vpop.f32.mrb[95].mxu1 }
 0x3fc   :  { %3102 = vst [vmem:[#allocation9 + $0x768] sm:$0xff] %v2105_v8  ;;  %3104 = vst [vmem:[#allocation9 + $0x778] sm:$0xff] %v2188_v9 }
 0x400   :  { %v2109_v10 = vpop.f32.mrb[88].mxu0  ;;  %v2192_v11 = vpop.f32.mrb[96].mxu1 }
 0x401   :  { %3133 = vst [vmem:[#allocation9 + $0x860] sm:$0xff] %v2109_v10  ;;  %3135 = vst [vmem:[#allocation9 + $0x870] sm:$0xff] %v2192_v11  ;;  %v2111_v12 = vpop.f32.mrb[89].mxu0  ;;  %v2194_v13 = vpop.f32.mrb[97].mxu1 }
 0x402   :  { %3134 = vst [vmem:[#allocation9 + $0x868] sm:$0xff] %v2111_v12  ;;  %3136 = vst [vmem:[#allocation9 + $0x878] sm:$0xff] %v2194_v13  ;;  %v2113_v14 = vpop.f32.mrb[90].mxu0  ;;  %v2196_v15 = vpop.f32.mrb[98].mxu1 }
 0x403   :  { %3165 = vst [vmem:[#allocation9 + $0x960] sm:$0xff] %v2113_v14  ;;  %3167 = vst [vmem:[#allocation9 + $0x970] sm:$0xff] %v2196_v15  ;;  %v2115_v16 = vpop.f32.mrb[91].mxu0  ;;  %v2198_v17 = vpop.f32.mrb[99].mxu1 }
 0x404   :  { %3166 = vst [vmem:[#allocation9 + $0x968] sm:$0xff] %v2115_v16  ;;  %3168 = vst [vmem:[#allocation9 + $0x978] sm:$0xff] %v2198_v17 }
 0x408   :  { %v2235_v18 = vpop.f32.mrb[92].mxu0  ;;  %v2318_v19 = vpop.f32.mrb[100].mxu1 }
 0x409   :  { %2881 = vst [vmem:[#allocation9 + $0x80] sm:$0xff] %v2235_v18  ;;  %2883 = vst [vmem:[#allocation9 + $0x90] sm:$0xff] %v2318_v19  ;;  %v2237_v20 = vpop.f32.mrb[93].mxu0  ;;  %v2320_v21 = vpop.f32.mrb[101].mxu1 }
 0x40a   :  { %2882 = vst [vmem:[#allocation9 + $0x88] sm:$0xff] %v2237_v20  ;;  %2884 = vst [vmem:[#allocation9 + $0x98] sm:$0xff] %v2320_v21  ;;  %v2239_v22 = vpop.f32.mrb[94].mxu0  ;;  %v2322_v7 = vpop.f32.mrb[102].mxu1 }
 0x40b   :  { %2913 = vst [vmem:[#allocation9 + $0x180] sm:$0xff] %v2239_v22  ;;  %2915 = vst [vmem:[#allocation9 + $0x190] sm:$0xff] %v2322_v7  ;;  %v2241_v24 = vpop.f32.mrb[95].mxu0  ;;  %v2324_v25 = vpop.f32.mrb[103].mxu1 }
 0x40c   :  { %2914 = vst [vmem:[#allocation9 + $0x188] sm:$0xff] %v2241_v24  ;;  %2916 = vst [vmem:[#allocation9 + $0x198] sm:$0xff] %v2324_v25 }
 0x410   :  { %v2245_v0 = vpop.f32.mrb[96].mxu0  ;;  %v2328_v26 = vpop.f32.mrb[104].mxu1 }
 0x411   :  { %2945 = vst [vmem:[#allocation9 + $0x280] sm:$0xff] %v2245_v0  ;;  %2947 = vst [vmem:[#allocation9 + $0x290] sm:$0xff] %v2328_v26  ;;  %v2247_v27 = vpop.f32.mrb[97].mxu0  ;;  %v2330_v28 = vpop.f32.mrb[105].mxu1 }
 0x412   :  { %2946 = vst [vmem:[#allocation9 + $0x288] sm:$0xff] %v2247_v27  ;;  %2948 = vst [vmem:[#allocation9 + $0x298] sm:$0xff] %v2330_v28  ;;  %v2249_v29 = vpop.f32.mrb[98].mxu0  ;;  %v2332_v30 = vpop.f32.mrb[106].mxu1 }
 0x413   :  { %2977 = vst [vmem:[#allocation9 + $0x380] sm:$0xff] %v2249_v29  ;;  %2979 = vst [vmem:[#allocation9 + $0x390] sm:$0xff] %v2332_v30  ;;  %v2251_v31 = vpop.f32.mrb[99].mxu0  ;;  %v2334_v34 = vpop.f32.mrb[107].mxu1 }
 0x414   :  { %2978 = vst [vmem:[#allocation9 + $0x388] sm:$0xff] %v2251_v31  ;;  %2980 = vst [vmem:[#allocation9 + $0x398] sm:$0xff] %v2334_v34 }
 0x418   :  { %v2255_v35 = vpop.f32.mrb[100].mxu0  ;;  %v2338_v36 = vpop.f32.mrb[108].mxu1 }
 0x419   :  { %3009 = vst [vmem:[#allocation9 + $0x480] sm:$0xff] %v2255_v35  ;;  %3011 = vst [vmem:[#allocation9 + $0x490] sm:$0xff] %v2338_v36  ;;  %v2257_v37 = vpop.f32.mrb[101].mxu0  ;;  %v2340_v38 = vpop.f32.mrb[109].mxu1 }
 0x41a   :  { %3010 = vst [vmem:[#allocation9 + $0x488] sm:$0xff] %v2257_v37  ;;  %3012 = vst [vmem:[#allocation9 + $0x498] sm:$0xff] %v2340_v38  ;;  %v2259_v23 = vpop.f32.mrb[102].mxu0  ;;  %v2342_v39 = vpop.f32.mrb[110].mxu1 }
 0x41b   :  { %3041 = vst [vmem:[#allocation9 + $0x580] sm:$0xff] %v2259_v23  ;;  %3043 = vst [vmem:[#allocation9 + $0x590] sm:$0xff] %v2342_v39  ;;  %v2261_v40 = vpop.f32.mrb[103].mxu0  ;;  %v2344_v41 = vpop.f32.mrb[111].mxu1 }
 0x41c   :  { %3042 = vst [vmem:[#allocation9 + $0x588] sm:$0xff] %v2261_v40  ;;  %3044 = vst [vmem:[#allocation9 + $0x598] sm:$0xff] %v2344_v41 }
 0x420   :  { %v2265_v32 = vpop.f32.mrb[104].mxu0  ;;  %v2348_v42 = vpop.f32.mrb[112].mxu1 }
 0x421   :  { %3073 = vst [vmem:[#allocation9 + $0x680] sm:$0xff] %v2265_v32  ;;  %3075 = vst [vmem:[#allocation9 + $0x690] sm:$0xff] %v2348_v42  ;;  %v2267_v43 = vpop.f32.mrb[105].mxu0  ;;  %v2350_v44 = vpop.f32.mrb[113].mxu1 }
 0x422   :  { %3074 = vst [vmem:[#allocation9 + $0x688] sm:$0xff] %v2267_v43  ;;  %3076 = vst [vmem:[#allocation9 + $0x698] sm:$0xff] %v2350_v44  ;;  %v2269_v45 = vpop.f32.mrb[106].mxu0  ;;  %v2352_v46 = vpop.f32.mrb[114].mxu1 }
 0x423   :  { %3105 = vst [vmem:[#allocation9 + $0x780] sm:$0xff] %v2269_v45  ;;  %3107 = vst [vmem:[#allocation9 + $0x790] sm:$0xff] %v2352_v46  ;;  %v2271_v48 = vpop.f32.mrb[107].mxu0  ;;  %v2354_v49 = vpop.f32.mrb[115].mxu1 }
 0x424   :  { %3106 = vst [vmem:[#allocation9 + $0x788] sm:$0xff] %v2271_v48  ;;  %3108 = vst [vmem:[#allocation9 + $0x798] sm:$0xff] %v2354_v49 }
 0x428   :  { %v2275_v50 = vpop.f32.mrb[108].mxu0  ;;  %v2358_v51 = vpop.f32.mrb[116].mxu1 }
 0x429   :  { %3137 = vst [vmem:[#allocation9 + $0x880] sm:$0xff] %v2275_v50  ;;  %3139 = vst [vmem:[#allocation9 + $0x890] sm:$0xff] %v2358_v51  ;;  %v2277_v33 = vpop.f32.mrb[109].mxu0  ;;  %v2360_v52 = vpop.f32.mrb[117].mxu1 }
 0x42a   :  { %3138 = vst [vmem:[#allocation9 + $0x888] sm:$0xff] %v2277_v33  ;;  %3140 = vst [vmem:[#allocation9 + $0x898] sm:$0xff] %v2360_v52  ;;  %v2279_v53 = vpop.f32.mrb[110].mxu0  ;;  %v2362_v54 = vpop.f32.mrb[118].mxu1 }
 0x42b   :  { %3169 = vst [vmem:[#allocation9 + $0x980] sm:$0xff] %v2279_v53  ;;  %3171 = vst [vmem:[#allocation9 + $0x990] sm:$0xff] %v2362_v54  ;;  %v2281_v55 = vpop.f32.mrb[111].mxu0  ;;  %v2364_v57 = vpop.f32.mrb[119].mxu1 }
 0x42c   :  { %3170 = vst [vmem:[#allocation9 + $0x988] sm:$0xff] %v2281_v55  ;;  %3172 = vst [vmem:[#allocation9 + $0x998] sm:$0xff] %v2364_v57 }
 0x430   :  { %v2401_v58 = vpop.f32.mrb[112].mxu0  ;;  %v2484_v59 = vpop.f32.mrb[120].mxu1 }
 0x431   :  { %2885 = vst [vmem:[#allocation9 + $0xa0] sm:$0xff] %v2401_v58  ;;  %2887 = vst [vmem:[#allocation9 + $0xb0] sm:$0xff] %v2484_v59  ;;  %v2403_v60 = vpop.f32.mrb[113].mxu0  ;;  %v2486_v61 = vpop.f32.mrb[121].mxu1 }
 0x432   :  { %2886 = vst [vmem:[#allocation9 + $0xa8] sm:$0xff] %v2403_v60  ;;  %2888 = vst [vmem:[#allocation9 + $0xb8] sm:$0xff] %v2486_v61  ;;  %v2405_v62 = vpop.f32.mrb[114].mxu0  ;;  %v2488_v63 = vpop.f32.mrb[122].mxu1 }
 0x433   :  { %2917 = vst [vmem:[#allocation9 + $0x1a0] sm:$0xff] %v2405_v62  ;;  %2919 = vst [vmem:[#allocation9 + $0x1b0] sm:$0xff] %v2488_v63  ;;  %v2407_v1 = vpop.f32.mrb[115].mxu0  ;;  %v2490_v56 = vpop.f32.mrb[123].mxu1 }
 0x434   :  { %2918 = vst [vmem:[#allocation9 + $0x1a8] sm:$0xff] %v2407_v1  ;;  %2920 = vst [vmem:[#allocation9 + $0x1b8] sm:$0xff] %v2490_v56 }
 0x438   :  { %v2411_v2 = vpop.f32.mrb[116].mxu0  ;;  %v2494_v3 = vpop.f32.mrb[124].mxu1 }
 0x439   :  { %2949 = vst [vmem:[#allocation9 + $0x2a0] sm:$0xff] %v2411_v2  ;;  %2951 = vst [vmem:[#allocation9 + $0x2b0] sm:$0xff] %v2494_v3  ;;  %v2413_v4 = vpop.f32.mrb[117].mxu0  ;;  %v2496_v47 = vpop.f32.mrb[125].mxu1 }
 0x43a   :  { %2950 = vst [vmem:[#allocation9 + $0x2a8] sm:$0xff] %v2413_v4  ;;  %2952 = vst [vmem:[#allocation9 + $0x2b8] sm:$0xff] %v2496_v47  ;;  %v2415_v5 = vpop.f32.mrb[118].mxu0  ;;  %v2498_v6 = vpop.f32.mrb[126].mxu1 }
 0x43b   :  { %2981 = vst [vmem:[#allocation9 + $0x3a0] sm:$0xff] %v2415_v5  ;;  %2983 = vst [vmem:[#allocation9 + $0x3b0] sm:$0xff] %v2498_v6  ;;  %v2417_v8 = vpop.f32.mrb[119].mxu0  ;;  %v2500_v9 = vpop.f32.mrb[127].mxu1 }
 0x43c   :  { %2982 = vst [vmem:[#allocation9 + $0x3a8] sm:$0xff] %v2417_v8  ;;  %2984 = vst [vmem:[#allocation9 + $0x3b8] sm:$0xff] %v2500_v9 }
 0x440   :  { %v2421_v10 = vpop.f32.mrb[120].mxu0  ;;  %v2504_v11 = vpop.f32.mrb[128].mxu1 }
 0x441   :  { %3013 = vst [vmem:[#allocation9 + $0x4a0] sm:$0xff] %v2421_v10  ;;  %3015 = vst [vmem:[#allocation9 + $0x4b0] sm:$0xff] %v2504_v11  ;;  %v2423_v12 = vpop.f32.mrb[121].mxu0  ;;  %v2506_v13 = vpop.f32.mrb[129].mxu1 }
 0x442   :  { %3014 = vst [vmem:[#allocation9 + $0x4a8] sm:$0xff] %v2423_v12  ;;  %3016 = vst [vmem:[#allocation9 + $0x4b8] sm:$0xff] %v2506_v13  ;;  %v2425_v14 = vpop.f32.mrb[122].mxu0  ;;  %v2508_v15 = vpop.f32.mrb[130].mxu1 }
 0x443   :  { %3045 = vst [vmem:[#allocation9 + $0x5a0] sm:$0xff] %v2425_v14  ;;  %3047 = vst [vmem:[#allocation9 + $0x5b0] sm:$0xff] %v2508_v15  ;;  %v2427_v16 = vpop.f32.mrb[123].mxu0  ;;  %v2510_v17 = vpop.f32.mrb[131].mxu1 }
 0x444   :  { %3046 = vst [vmem:[#allocation9 + $0x5a8] sm:$0xff] %v2427_v16  ;;  %3048 = vst [vmem:[#allocation9 + $0x5b8] sm:$0xff] %v2510_v17 }
 0x448   :  { %v2431_v18 = vpop.f32.mrb[124].mxu0  ;;  %v2514_v19 = vpop.f32.mrb[132].mxu1 }
 0x449   :  { %3077 = vst [vmem:[#allocation9 + $0x6a0] sm:$0xff] %v2431_v18  ;;  %3079 = vst [vmem:[#allocation9 + $0x6b0] sm:$0xff] %v2514_v19  ;;  %v2433_v20 = vpop.f32.mrb[125].mxu0  ;;  %v2516_v21 = vpop.f32.mrb[133].mxu1 }
 0x44a   :  { %3078 = vst [vmem:[#allocation9 + $0x6a8] sm:$0xff] %v2433_v20  ;;  %3080 = vst [vmem:[#allocation9 + $0x6b8] sm:$0xff] %v2516_v21  ;;  %v2435_v22 = vpop.f32.mrb[126].mxu0  ;;  %v2518_v7 = vpop.f32.mrb[134].mxu1 }
 0x44b   :  { %3109 = vst [vmem:[#allocation9 + $0x7a0] sm:$0xff] %v2435_v22  ;;  %3111 = vst [vmem:[#allocation9 + $0x7b0] sm:$0xff] %v2518_v7  ;;  %v2437_v24 = vpop.f32.mrb[127].mxu0  ;;  %v2520_v25 = vpop.f32.mrb[135].mxu1 }
 0x44c   :  { %3110 = vst [vmem:[#allocation9 + $0x7a8] sm:$0xff] %v2437_v24  ;;  %3112 = vst [vmem:[#allocation9 + $0x7b8] sm:$0xff] %v2520_v25 }
 0x450   :  { %v2441_v0 = vpop.f32.mrb[128].mxu0  ;;  %v2524_v26 = vpop.f32.mrb[136].mxu1 }
 0x451   :  { %3141 = vst [vmem:[#allocation9 + $0x8a0] sm:$0xff] %v2441_v0  ;;  %3143 = vst [vmem:[#allocation9 + $0x8b0] sm:$0xff] %v2524_v26  ;;  %v2443_v27 = vpop.f32.mrb[129].mxu0  ;;  %v2526_v28 = vpop.f32.mrb[137].mxu1 }
 0x452   :  { %3142 = vst [vmem:[#allocation9 + $0x8a8] sm:$0xff] %v2443_v27  ;;  %3144 = vst [vmem:[#allocation9 + $0x8b8] sm:$0xff] %v2526_v28  ;;  %v2445_v29 = vpop.f32.mrb[130].mxu0  ;;  %v2528_v30 = vpop.f32.mrb[138].mxu1 }
 0x453   :  { %3173 = vst [vmem:[#allocation9 + $0x9a0] sm:$0xff] %v2445_v29  ;;  %3175 = vst [vmem:[#allocation9 + $0x9b0] sm:$0xff] %v2528_v30  ;;  %v2447_v31 = vpop.f32.mrb[131].mxu0  ;;  %v2530_v34 = vpop.f32.mrb[139].mxu1 }
 0x454   :  { %3174 = vst [vmem:[#allocation9 + $0x9a8] sm:$0xff] %v2447_v31  ;;  %3176 = vst [vmem:[#allocation9 + $0x9b8] sm:$0xff] %v2530_v34 }
 0x458   :  { %v2567_v35 = vpop.f32.mrb[132].mxu0  ;;  %v2650_v36 = vpop.f32.mrb[140].mxu1 }
 0x459   :  { %2889 = vst [vmem:[#allocation9 + $0xc0] sm:$0xff] %v2567_v35  ;;  %2891 = vst [vmem:[#allocation9 + $0xd0] sm:$0xff] %v2650_v36  ;;  %v2569_v37 = vpop.f32.mrb[133].mxu0  ;;  %v2652_v38 = vpop.f32.mrb[141].mxu1 }
 0x45a   :  { %2890 = vst [vmem:[#allocation9 + $0xc8] sm:$0xff] %v2569_v37  ;;  %2892 = vst [vmem:[#allocation9 + $0xd8] sm:$0xff] %v2652_v38  ;;  %v2571_v23 = vpop.f32.mrb[134].mxu0  ;;  %v2654_v39 = vpop.f32.mrb[142].mxu1 }
 0x45b   :  { %2921 = vst [vmem:[#allocation9 + $0x1c0] sm:$0xff] %v2571_v23  ;;  %2923 = vst [vmem:[#allocation9 + $0x1d0] sm:$0xff] %v2654_v39  ;;  %v2573_v40 = vpop.f32.mrb[135].mxu0  ;;  %v2656_v41 = vpop.f32.mrb[143].mxu1 }
 0x45c   :  { %2922 = vst [vmem:[#allocation9 + $0x1c8] sm:$0xff] %v2573_v40  ;;  %2924 = vst [vmem:[#allocation9 + $0x1d8] sm:$0xff] %v2656_v41 }
 0x460   :  { %v2577_v32 = vpop.f32.mrb[136].mxu0  ;;  %v2660_v42 = vpop.f32.mrb[144].mxu1 }
 0x461   :  { %2953 = vst [vmem:[#allocation9 + $0x2c0] sm:$0xff] %v2577_v32  ;;  %2955 = vst [vmem:[#allocation9 + $0x2d0] sm:$0xff] %v2660_v42  ;;  %v2579_v43 = vpop.f32.mrb[137].mxu0  ;;  %v2662_v44 = vpop.f32.mrb[145].mxu1 }
 0x462   :  { %2954 = vst [vmem:[#allocation9 + $0x2c8] sm:$0xff] %v2579_v43  ;;  %2956 = vst [vmem:[#allocation9 + $0x2d8] sm:$0xff] %v2662_v44  ;;  %v2581_v45 = vpop.f32.mrb[138].mxu0  ;;  %v2664_v46 = vpop.f32.mrb[146].mxu1 }
 0x463   :  { %2985 = vst [vmem:[#allocation9 + $0x3c0] sm:$0xff] %v2581_v45  ;;  %2987 = vst [vmem:[#allocation9 + $0x3d0] sm:$0xff] %v2664_v46  ;;  %v2583_v48 = vpop.f32.mrb[139].mxu0  ;;  %v2666_v49 = vpop.f32.mrb[147].mxu1 }
 0x464   :  { %2986 = vst [vmem:[#allocation9 + $0x3c8] sm:$0xff] %v2583_v48  ;;  %2988 = vst [vmem:[#allocation9 + $0x3d8] sm:$0xff] %v2666_v49 }
 0x468   :  { %v2587_v50 = vpop.f32.mrb[140].mxu0  ;;  %v2670_v51 = vpop.f32.mrb[148].mxu1 }
 0x469   :  { %3017 = vst [vmem:[#allocation9 + $0x4c0] sm:$0xff] %v2587_v50  ;;  %3019 = vst [vmem:[#allocation9 + $0x4d0] sm:$0xff] %v2670_v51  ;;  %v2589_v33 = vpop.f32.mrb[141].mxu0  ;;  %v2672_v52 = vpop.f32.mrb[149].mxu1 }
 0x46a   :  { %3018 = vst [vmem:[#allocation9 + $0x4c8] sm:$0xff] %v2589_v33  ;;  %3020 = vst [vmem:[#allocation9 + $0x4d8] sm:$0xff] %v2672_v52  ;;  %v2591_v53 = vpop.f32.mrb[142].mxu0  ;;  %v2674_v54 = vpop.f32.mrb[150].mxu1 }
 0x46b   :  { %3049 = vst [vmem:[#allocation9 + $0x5c0] sm:$0xff] %v2591_v53  ;;  %3051 = vst [vmem:[#allocation9 + $0x5d0] sm:$0xff] %v2674_v54  ;;  %v2593_v55 = vpop.f32.mrb[143].mxu0  ;;  %v2676_v57 = vpop.f32.mrb[151].mxu1 }
 0x46c   :  { %3050 = vst [vmem:[#allocation9 + $0x5c8] sm:$0xff] %v2593_v55  ;;  %3052 = vst [vmem:[#allocation9 + $0x5d8] sm:$0xff] %v2676_v57 }
 0x470   :  { %v2597_v58 = vpop.f32.mrb[144].mxu0  ;;  %v2680_v59 = vpop.f32.mrb[152].mxu1 }
 0x471   :  { %3081 = vst [vmem:[#allocation9 + $0x6c0] sm:$0xff] %v2597_v58  ;;  %3083 = vst [vmem:[#allocation9 + $0x6d0] sm:$0xff] %v2680_v59  ;;  %v2599_v60 = vpop.f32.mrb[145].mxu0  ;;  %v2682_v61 = vpop.f32.mrb[153].mxu1 }
 0x472   :  { %3082 = vst [vmem:[#allocation9 + $0x6c8] sm:$0xff] %v2599_v60  ;;  %3084 = vst [vmem:[#allocation9 + $0x6d8] sm:$0xff] %v2682_v61  ;;  %v2601_v62 = vpop.f32.mrb[146].mxu0  ;;  %v2684_v63 = vpop.f32.mrb[154].mxu1 }
 0x473   :  { %3113 = vst [vmem:[#allocation9 + $0x7c0] sm:$0xff] %v2601_v62  ;;  %3115 = vst [vmem:[#allocation9 + $0x7d0] sm:$0xff] %v2684_v63  ;;  %v2603_v1 = vpop.f32.mrb[147].mxu0  ;;  %v2686_v56 = vpop.f32.mrb[155].mxu1 }
 0x474   :  { %3114 = vst [vmem:[#allocation9 + $0x7c8] sm:$0xff] %v2603_v1  ;;  %3116 = vst [vmem:[#allocation9 + $0x7d8] sm:$0xff] %v2686_v56 }
 0x478   :  { %v2607_v2 = vpop.f32.mrb[148].mxu0  ;;  %v2690_v3 = vpop.f32.mrb[156].mxu1 }
 0x479   :  { %3145 = vst [vmem:[#allocation9 + $0x8c0] sm:$0xff] %v2607_v2  ;;  %3147 = vst [vmem:[#allocation9 + $0x8d0] sm:$0xff] %v2690_v3  ;;  %v2609_v4 = vpop.f32.mrb[149].mxu0  ;;  %v2692_v47 = vpop.f32.mrb[157].mxu1 }
 0x47a   :  { %3146 = vst [vmem:[#allocation9 + $0x8c8] sm:$0xff] %v2609_v4  ;;  %3148 = vst [vmem:[#allocation9 + $0x8d8] sm:$0xff] %v2692_v47  ;;  %v2611_v5 = vpop.f32.mrb[150].mxu0  ;;  %v2694_v6 = vpop.f32.mrb[158].mxu1 }
 0x47b   :  { %3177 = vst [vmem:[#allocation9 + $0x9c0] sm:$0xff] %v2611_v5  ;;  %3179 = vst [vmem:[#allocation9 + $0x9d0] sm:$0xff] %v2694_v6  ;;  %v2613_v8 = vpop.f32.mrb[151].mxu0  ;;  %v2696_v9 = vpop.f32.mrb[159].mxu1 }
 0x47c   :  { %3178 = vst [vmem:[#allocation9 + $0x9c8] sm:$0xff] %v2613_v8  ;;  %3180 = vst [vmem:[#allocation9 + $0x9d8] sm:$0xff] %v2696_v9 }
 0x480   :  { %v2733_v10 = vpop.f32.mrb[152].mxu0  ;;  %v2816_v11 = vpop.f32.mrb[160].mxu1 }
 0x481   :  { %2893 = vst [vmem:[#allocation9 + $0xe0] sm:$0xff] %v2733_v10  ;;  %2895 = vst [vmem:[#allocation9 + $0xf0] sm:$0xff] %v2816_v11  ;;  %v2735_v12 = vpop.f32.mrb[153].mxu0  ;;  %v2818_v13 = vpop.f32.mrb[161].mxu1 }
 0x482   :  { %2894 = vst [vmem:[#allocation9 + $0xe8] sm:$0xff] %v2735_v12  ;;  %2896 = vst [vmem:[#allocation9 + $0xf8] sm:$0xff] %v2818_v13  ;;  %v2737_v14 = vpop.f32.mrb[154].mxu0  ;;  %v2820_v15 = vpop.f32.mrb[162].mxu1 }
 0x483   :  { %2925 = vst [vmem:[#allocation9 + $0x1e0] sm:$0xff] %v2737_v14  ;;  %2927 = vst [vmem:[#allocation9 + $0x1f0] sm:$0xff] %v2820_v15  ;;  %v2739_v16 = vpop.f32.mrb[155].mxu0  ;;  %v2822_v17 = vpop.f32.mrb[163].mxu1 }
 0x484   :  { %2926 = vst [vmem:[#allocation9 + $0x1e8] sm:$0xff] %v2739_v16  ;;  %2928 = vst [vmem:[#allocation9 + $0x1f8] sm:$0xff] %v2822_v17 }
 0x488   :  { %v2743_v18 = vpop.f32.mrb[156].mxu0  ;;  %v2826_v19 = vpop.f32.mrb[164].mxu1 }
 0x489   :  { %2957 = vst [vmem:[#allocation9 + $0x2e0] sm:$0xff] %v2743_v18  ;;  %2959 = vst [vmem:[#allocation9 + $0x2f0] sm:$0xff] %v2826_v19  ;;  %v2745_v20 = vpop.f32.mrb[157].mxu0  ;;  %v2828_v21 = vpop.f32.mrb[165].mxu1 }
 0x48a   :  { %2958 = vst [vmem:[#allocation9 + $0x2e8] sm:$0xff] %v2745_v20  ;;  %2960 = vst [vmem:[#allocation9 + $0x2f8] sm:$0xff] %v2828_v21  ;;  %v2747_v22 = vpop.f32.mrb[158].mxu0  ;;  %v2830_v7 = vpop.f32.mrb[166].mxu1 }
 0x48b   :  { %2989 = vst [vmem:[#allocation9 + $0x3e0] sm:$0xff] %v2747_v22  ;;  %2991 = vst [vmem:[#allocation9 + $0x3f0] sm:$0xff] %v2830_v7  ;;  %v2749_v24 = vpop.f32.mrb[159].mxu0  ;;  %v2832_v25 = vpop.f32.mrb[167].mxu1 }
 0x48c   :  { %2990 = vst [vmem:[#allocation9 + $0x3e8] sm:$0xff] %v2749_v24  ;;  %2992 = vst [vmem:[#allocation9 + $0x3f8] sm:$0xff] %v2832_v25 }
 0x490   :  { %v2753_v0 = vpop.f32.mrb[160].mxu0  ;;  %v2836_v26 = vpop.f32.mrb[168].mxu1 }
 0x491   :  { %3021 = vst [vmem:[#allocation9 + $0x4e0] sm:$0xff] %v2753_v0  ;;  %3023 = vst [vmem:[#allocation9 + $0x4f0] sm:$0xff] %v2836_v26  ;;  %v2755_v27 = vpop.f32.mrb[161].mxu0  ;;  %v2838_v28 = vpop.f32.mrb[169].mxu1 }
 0x492   :  { %3022 = vst [vmem:[#allocation9 + $0x4e8] sm:$0xff] %v2755_v27  ;;  %3024 = vst [vmem:[#allocation9 + $0x4f8] sm:$0xff] %v2838_v28  ;;  %v2757_v29 = vpop.f32.mrb[162].mxu0  ;;  %v2840_v30 = vpop.f32.mrb[170].mxu1 }
 0x493   :  { %3053 = vst [vmem:[#allocation9 + $0x5e0] sm:$0xff] %v2757_v29  ;;  %3055 = vst [vmem:[#allocation9 + $0x5f0] sm:$0xff] %v2840_v30  ;;  %v2759_v31 = vpop.f32.mrb[163].mxu0  ;;  %v2842_v34 = vpop.f32.mrb[171].mxu1 }
 0x494   :  { %3054 = vst [vmem:[#allocation9 + $0x5e8] sm:$0xff] %v2759_v31  ;;  %3056 = vst [vmem:[#allocation9 + $0x5f8] sm:$0xff] %v2842_v34 }
 0x498   :  { %v2763_v35 = vpop.f32.mrb[164].mxu0  ;;  %v2846_v36 = vpop.f32.mrb[172].mxu1 }
 0x499   :  { %3085 = vst [vmem:[#allocation9 + $0x6e0] sm:$0xff] %v2763_v35  ;;  %3087 = vst [vmem:[#allocation9 + $0x6f0] sm:$0xff] %v2846_v36  ;;  %v2765_v37 = vpop.f32.mrb[165].mxu0  ;;  %v2848_v38 = vpop.f32.mrb[173].mxu1 }
 0x49a   :  { %3086 = vst [vmem:[#allocation9 + $0x6e8] sm:$0xff] %v2765_v37  ;;  %3088 = vst [vmem:[#allocation9 + $0x6f8] sm:$0xff] %v2848_v38  ;;  %v2767_v23 = vpop.f32.mrb[166].mxu0  ;;  %v2850_v39 = vpop.f32.mrb[174].mxu1 }
 0x49b   :  { %3117 = vst [vmem:[#allocation9 + $0x7e0] sm:$0xff] %v2767_v23  ;;  %3119 = vst [vmem:[#allocation9 + $0x7f0] sm:$0xff] %v2850_v39  ;;  %v2769_v40 = vpop.f32.mrb[167].mxu0  ;;  %v2852_v41 = vpop.f32.mrb[175].mxu1 }
 0x49c   :  { %3118 = vst [vmem:[#allocation9 + $0x7e8] sm:$0xff] %v2769_v40  ;;  %3120 = vst [vmem:[#allocation9 + $0x7f8] sm:$0xff] %v2852_v41 }
 0x4a0   :  { %v2773_v32 = vpop.f32.mrb[168].mxu0  ;;  %v2856_v42 = vpop.f32.mrb[176].mxu1 }
 0x4a1   :  { %3149 = vst [vmem:[#allocation9 + $0x8e0] sm:$0xff] %v2773_v32  ;;  %3151 = vst [vmem:[#allocation9 + $0x8f0] sm:$0xff] %v2856_v42  ;;  %v2775_v43 = vpop.f32.mrb[169].mxu0  ;;  %v2858_v44 = vpop.f32.mrb[177].mxu1 }
 0x4a2   :  { %3150 = vst [vmem:[#allocation9 + $0x8e8] sm:$0xff] %v2775_v43  ;;  %3152 = vst [vmem:[#allocation9 + $0x8f8] sm:$0xff] %v2858_v44  ;;  %v2777_v45 = vpop.f32.mrb[170].mxu0  ;;  %v2860_v46 = vpop.f32.mrb[178].mxu1 }
 0x4a3   :  { %3181 = vst [vmem:[#allocation9 + $0x9e0] sm:$0xff] %v2777_v45  ;;  %3183 = vst [vmem:[#allocation9 + $0x9f0] sm:$0xff] %v2860_v46  ;;  %v2779_v48 = vpop.f32.mrb[171].mxu0  ;;  %v2862_v49 = vpop.f32.mrb[179].mxu1 }
 0x4a4   :  { %3182 = vst [vmem:[#allocation9 + $0x9e8] sm:$0xff] %v2779_v48  ;;  %3184 = vst [vmem:[#allocation9 + $0x9f8] sm:$0xff] %v2862_v49 }
 0x4a5   :  { %3722 = shalt.err (!%p3719_p0)
}
 0x4a6   :  { %s3723_s12 = scalar_lea.hbm %s4185_s6, 40960 }
 0x4a7   :  { %p3724_p1 = scmp.ne.s32.totalorder %s4185_s6, %s3723_s12  ;;  %p3727_p2 = scmp.lt.u32.totalorder %s3723_s12, %s4185_s6 }
 0x4a9   :  { %p3729_p3 = pnand %p3727_p2, %p3724_p1 }
 0x4ab   :  { %3732 = shalt.err (!%p3729_p3)
}
 0x4ac   :  { %s3752_s16 = smov 4096   ;;  %s3753_s17 = smov 256  }
 0x4ad   :  { %3196 = dma.vmem_to_hbm [thread:$0]  %s3191_s1, 40960, %s4185_s6, [#allocation5], %s3752_s16, %s3752_s16, %s3753_s17  }
 0x4ae   :  { %3737 = dma.done.wait [#allocation5], 40960  }
 0x4af   :  { %3738 = vsyncadd [#allocation5], 4294926336 }
 0x4b0   :  { %3200 = vsyncpa [#allocation4], 1 }
 0x4b1   :  { %3201 = vsyncpa [#allocation7], 1 }
 0x4b2   :  { %3202 = vsyncpa [#allocation5], 1 }

</bundles_post_ra>
